<compile_context>
chip_gen: v5e
topology: v5e:2x2
jax: 0.10.0
libtpu: 0.0.40
codegen_flags: <defaults>
</compile_context>

<pallas_src>
import functools

import jax
import jax.numpy as jnp
from jax import lax
from jax.experimental import pallas as pl
from jax.experimental.pallas import tpu as pltpu


def _round_up(x, m):
    return (x + m - 1) // m * m


# ---------------------------------------------------------------------------
# Kernel 1: fused conv (in-VMEM im2col over the KH*KW taps) + BN partial stats.
# Grid = (N,), "parallel" (independent per batch element).
# ---------------------------------------------------------------------------
def _conv_stats_kernel(x_ref, w_ref, y_ref, stats_ref, *,
                       KH, KW, OH, OW, stride, dilation):
    # x_ref:     (1, Hp, Wp, Cin)   padded NHWC image for this batch element
    # w_ref:     (KH*KW, Cin, Cout) one (Cin, Cout) weight matrix per tap
    # y_ref:     (1, OH*OW, Cout)   conv output (pre-BN), f32
    # stats_ref: (1, 2, Cout)       [sum, sum_of_squares] over this image
    cin = x_ref.shape[-1]
    cout = w_ref.shape[-1]

    # Only load the whole block up-front if we need strided array slicing.
    xv = x_ref[0] if stride != 1 else None

    acc = jnp.zeros((OH * OW, cout), jnp.float32)
    for kh in range(KH):
        h0 = kh * dilation
        for kw in range(KW):
            w0 = kw * dilation
            if stride == 1:
                patch = x_ref[0, h0:h0 + OH, w0:w0 + OW, :]       # (OH, OW, Cin)
            else:
                patch = lax.slice(
                    xv,
                    (h0, w0, 0),
                    (h0 + (OH - 1) * stride + 1,
                     w0 + (OW - 1) * stride + 1, cin),
                    (stride, stride, 1))                          # (OH, OW, Cin)
            a = patch.reshape(OH * OW, cin)   # leading-dim merge (layout-cheap)
            acc = acc + jnp.dot(a, w_ref[kh * KW + kw],
                                preferred_element_type=jnp.float32)

    y_ref[0] = acc
    s1 = jnp.sum(acc, axis=0, keepdims=True)           # (1, Cout)
    s2 = jnp.sum(acc * acc, axis=0, keepdims=True)     # (1, Cout)
    stats_ref[0] = jnp.concatenate([s1, s2], axis=0)   # (2, Cout)


# ---------------------------------------------------------------------------
# Kernel 2: y * scale + shift, then ReLU.  Tiled over rows, lane-dense.
# ---------------------------------------------------------------------------
def _scale_shift_relu_kernel(y_ref, scale_ref, shift_ref, o_ref):
    o_ref[...] = jnp.maximum(y_ref[...] * scale_ref[...] + shift_ref[...], 0.0)


# ---------------------------------------------------------------------------
# Wrapper
# ---------------------------------------------------------------------------
@functools.partial(jax.jit,
                   static_argnames=("stride", "padding", "dilation", "compute_dtype"))
def base_conv2d(x_nchw, weight, gamma, beta, *,
                stride=1, padding=0, dilation=1, compute_dtype=jnp.float32):
    """BaseConv2d forward.  x_nchw: (N, Cin, H, W); weight: (Cout, Cin, KH, KW).

    Conv bias=False (module default; a conv bias would cancel in the BN mean
    subtraction anyway).  BatchNorm2d uses batch statistics (training mode),
    biased variance, eps=1e-5, affine gamma/beta.
    # TODO(synk): groups > 1 (grouped conv) is not implemented; only groups=1.
    """
    N, Cin, H, W = x_nchw.shape
    Cout, _, KH, KW = weight.shape
    OH = (H + 2 * padding - dilation * (KH - 1) - 1) // stride + 1
    OW = (W + 2 * padding - dilation * (KW - 1) - 1) // stride + 1
    Hp, Wp = H + 2 * padding, W + 2 * padding
    M = N * OH * OW

    # NCHW -> NHWC (channels on lanes), single spatial pad.  No im2col in HBM.
    x_nhwc = jnp.transpose(x_nchw, (0, 2, 3, 1))
    x_p = jnp.pad(x_nhwc, ((0, 0), (padding, padding),
                           (padding, padding), (0, 0))).astype(compute_dtype)
    # (Cout, Cin, KH, KW) -> (KH*KW, Cin, Cout)
    w_taps = jnp.transpose(weight, (2, 3, 1, 0)).reshape(KH * KW, Cin, Cout)
    w_taps = w_taps.astype(compute_dtype)

    kernel1 = functools.partial(_conv_stats_kernel, KH=KH, KW=KW, OH=OH, OW=OW,
                                stride=stride, dilation=dilation)
    itemsize = jnp.dtype(compute_dtype).itemsize
    flops1 = 2 * M * KH * KW * Cin * Cout + 3 * M * Cout
    bytes1 = (x_p.size * itemsize + w_taps.size * itemsize
              + M * Cout * 4 + N * 2 * Cout * 4)

    y, stats = pl.pallas_call(
        kernel1,
        out_shape=(jax.ShapeDtypeStruct((N, OH * OW, Cout), jnp.float32),
                   jax.ShapeDtypeStruct((N, 2, Cout), jnp.float32)),
        grid_spec=pltpu.PrefetchScalarGridSpec(
            num_scalar_prefetch=0,
            grid=(N,),
            in_specs=[
                pl.BlockSpec((1, Hp, Wp, Cin), lambda n: (n, 0, 0, 0)),
                pl.BlockSpec((KH * KW, Cin, Cout), lambda n: (0, 0, 0)),
            ],
            out_specs=(
                pl.BlockSpec((1, OH * OW, Cout), lambda n: (n, 0, 0)),
                pl.BlockSpec((1, 2, Cout), lambda n: (n, 0, 0)),
            ),
        ),
        compiler_params=pltpu.CompilerParams(
            dimension_semantics=("parallel",),
            vmem_limit_bytes=32 * 1024 * 1024),
        cost_estimate=pl.CostEstimate(flops=flops1, transcendentals=0,
                                      bytes_accessed=bytes1),
    )(x_p, w_taps)

    # --- BN finalize: exact full-M statistics from the fused partial sums ----
    tot = jnp.sum(stats, axis=0)                        # (2, Cout)
    mean = tot[0] / M
    var = jnp.maximum(tot[1] / M - mean * mean, 0.0)    # biased variance
    inv_std = lax.rsqrt(var + 1e-5)
    scale = gamma.astype(jnp.float32) * inv_std         # (Cout,)
    shift = beta.astype(jnp.float32) - mean * scale     # (Cout,)

    # --- Kernel 2: tiled, lane-dense normalize + ReLU ------------------------
    y_flat = y.reshape(M, Cout)
    lane_dense = (Cout <= 128) and (128 % Cout == 0) and ((M * Cout) % 128 == 0)
    if lane_dense:
        L = 128
        rows = (M * Cout) // L
        y2 = y_flat.reshape(rows, L)                     # free row-major reshape
        sc = jnp.tile(scale, L // Cout).reshape(1, L)    # channel = lane % Cout
        sh = jnp.tile(shift, L // Cout).reshape(1, L)
    else:
        L = Cout
        rows = M
        y2 = y_flat
        sc = scale.reshape(1, Cout)
        sh = shift.reshape(1, Cout)

    TR = 512 if rows >= 512 else _round_up(rows, 8)
    grid_r = pl.cdiv(rows, TR)
    rows_pad = grid_r * TR
    if rows_pad != rows:
        y2 = jnp.pad(y2, ((0, rows_pad - rows), (0, 0)))

    flops2 = 3 * rows_pad * L
    bytes2 = 2 * rows_pad * L * 4 + 2 * L * 4
    out2 = pl.pallas_call(
        _scale_shift_relu_kernel,
        out_shape=jax.ShapeDtypeStruct((rows_pad, L), jnp.float32),
        grid_spec=pltpu.PrefetchScalarGridSpec(
            num_scalar_prefetch=0,
            grid=(grid_r,),
            in_specs=[
                pl.BlockSpec((TR, L), lambda i: (i, 0)),
                pl.BlockSpec((1, L), lambda i: (0, 0)),
                pl.BlockSpec((1, L), lambda i: (0, 0)),
            ],
            out_specs=pl.BlockSpec((TR, L), lambda i: (i, 0)),
        ),
        compiler_params=pltpu.CompilerParams(
            dimension_semantics=("parallel",),
            vmem_limit_bytes=32 * 1024 * 1024),
        cost_estimate=pl.CostEstimate(flops=flops2, transcendentals=0,
                                      bytes_accessed=bytes2),
    )(y2, sc, sh)

    out_flat = out2[:rows].reshape(M, Cout)
    out_nhwc = out_flat.reshape(N, OH, OW, Cout)
    return jnp.transpose(out_nhwc, (0, 3, 1, 2)).astype(x_nchw.dtype)


# ---------------------------------------------------------------------------
# Pure-JAX reference (for a correctness sanity check in the demo)
# ---------------------------------------------------------------------------
def _reference(x, w, gamma, beta, stride, padding, dilation):
    y = lax.conv_general_dilated(
        x, w, window_strides=(stride, stride),
        padding=[(padding, padding), (padding, padding)],
        rhs_dilation=(dilation, dilation),
        dimension_numbers=("NCHW", "OIHW", "NCHW"),
        precision=lax.Precision.HIGHEST)
    mean = jnp.mean(y, axis=(0, 2, 3), keepdims=True)
    var = jnp.mean((y - mean) ** 2, axis=(0, 2, 3), keepdims=True)
    yn = (y - mean) * lax.rsqrt(var + 1e-5)
    yn = yn * gamma.reshape(1, -1, 1, 1) + beta.reshape(1, -1, 1, 1)
    return jnp.maximum(yn, 0.0)


# ---------------------------------------------------------------------------
# Demo
# ---------------------------------------------------------------------------
if __name__ == "__main__":
    key = jax.random.PRNGKey(0)
    k_x, k_w, k_g, k_b = jax.random.split(key, 4)

    # BaseConv2d(in_planes=4, out_planes=8, kernel_size=3, stride=1, padding=1)
    N, Cin, H, W = 2, 4, 16, 16
    Cout, KH, KW = 8, 3, 3
    stride, padding, dilation = 1, 1, 1

    x = jax.random.normal(k_x, (N, Cin, H, W), dtype=jnp.float32)
    weight = jax.random.normal(k_w, (Cout, Cin, KH, KW), dtype=jnp.float32) * 0.1
    gamma = 1.0 + 0.1 * jax.random.normal(k_g, (Cout,), dtype=jnp.float32)
    beta = 0.1 * jax.random.normal(k_b, (Cout,), dtype=jnp.float32)

    out = base_conv2d(x, weight, gamma, beta,
                      stride=stride, padding=padding, dilation=dilation)
    out = jax.block_until_ready(out)

    assert out.shape == (N, Cout, H, W), out.shape
    assert bool(jnp.all(out >= 0.0)), "ReLU output must be non-negative"

    ref = _reference(x, weight, gamma, beta, stride, padding, dilation)
    max_err = float(jnp.max(jnp.abs(out - ref)))
    assert max_err < 2e-2, f"mismatch vs reference: {max_err}"

    print("KERNEL_OK")
</pallas_src>

<mosaic_0001>
module attributes {stable_mosaic.version = 11 : i64} {
  func.func @_conv_stats_kernel(%arg0: i32, %arg1: memref<1x18x18x4xf32, #tpu.memory_space<vmem>>, %arg2: memref<9x4x8xf32, #tpu.memory_space<vmem>>, %arg3: memref<1x256x8xf32, #tpu.memory_space<vmem>>, %arg4: memref<1x2x8xf32, #tpu.memory_space<vmem>>) attributes {dimension_semantics = [#tpu.dimension_semantics<parallel>], iteration_bounds = array<i64: 2>, scalar_prefetch = 0 : i64, scratch_operands = 0 : i64, tpu.core_type = #tpu.core_type<tc>, window_params = [{transform_indices = @transform_0, window_bounds = array<i64: 1, 18, 18, 4>}, {pipeline_mode = #tpu.pipeline_mode<synchronous>, transform_indices = @transform_1, window_bounds = array<i64: 9, 4, 8>}, {transform_indices = @transform_2, window_bounds = array<i64: 1, 256, 8>}, {transform_indices = @transform_3, window_bounds = array<i64: 1, 2, 8>}]} {
    %cst = arith.constant 0.000000e+00 : f32
    %0 = vector.broadcast %cst : f32 to vector<256x8xf32>
    %c0 = arith.constant 0 : index
    %c0_0 = arith.constant 0 : index
    %c0_1 = arith.constant 0 : index
    %c0_2 = arith.constant 0 : index
    %1 = vector.load %arg1[%c0, %c0_0, %c0_1, %c0_2] : memref<1x18x18x4xf32, #tpu.memory_space<vmem>>, vector<1x16x16x4xf32>
    %2 = vector.shape_cast %1 : vector<1x16x16x4xf32> to vector<16x16x4xf32>
    %3 = vector.shape_cast %2 : vector<16x16x4xf32> to vector<256x4xf32>
    %c0_3 = arith.constant 0 : index
    %c0_4 = arith.constant 0 : index
    %c0_5 = arith.constant 0 : index
    %4 = vector.load %arg2[%c0_3, %c0_4, %c0_5] : memref<9x4x8xf32, #tpu.memory_space<vmem>>, vector<1x4x8xf32>
    %5 = vector.shape_cast %4 : vector<1x4x8xf32> to vector<4x8xf32>
    %cst_6 = arith.constant dense<0.000000e+00> : vector<256x8xf32>
    %6 = tpu.matmul %3, %5, %cst_6 {dimension_numbers = #tpu.dot_dimension_numbers<[1], [0], [0], [1], [0, 0, 1, 1], [], []>} : vector<256x4xf32>, vector<4x8xf32>, vector<256x8xf32> -> vector<256x8xf32>
    %7 = arith.addf %0, %6 : vector<256x8xf32>
    %c0_7 = arith.constant 0 : index
    %c0_8 = arith.constant 0 : index
    %c1 = arith.constant 1 : index
    %c0_9 = arith.constant 0 : index
    %8 = vector.load %arg1[%c0_7, %c0_8, %c1, %c0_9] : memref<1x18x18x4xf32, #tpu.memory_space<vmem>>, vector<1x16x16x4xf32>
    %9 = vector.shape_cast %8 : vector<1x16x16x4xf32> to vector<16x16x4xf32>
    %10 = vector.shape_cast %9 : vector<16x16x4xf32> to vector<256x4xf32>
    %c1_10 = arith.constant 1 : index
    %c0_11 = arith.constant 0 : index
    %c0_12 = arith.constant 0 : index
    %11 = vector.load %arg2[%c1_10, %c0_11, %c0_12] : memref<9x4x8xf32, #tpu.memory_space<vmem>>, vector<1x4x8xf32>
    %12 = vector.shape_cast %11 : vector<1x4x8xf32> to vector<4x8xf32>
    %cst_13 = arith.constant dense<0.000000e+00> : vector<256x8xf32>
    %13 = tpu.matmul %10, %12, %cst_13 {dimension_numbers = #tpu.dot_dimension_numbers<[1], [0], [0], [1], [0, 0, 1, 1], [], []>} : vector<256x4xf32>, vector<4x8xf32>, vector<256x8xf32> -> vector<256x8xf32>
    %14 = arith.addf %7, %13 : vector<256x8xf32>
    %c0_14 = arith.constant 0 : index
    %c0_15 = arith.constant 0 : index
    %c2 = arith.constant 2 : index
    %c0_16 = arith.constant 0 : index
    %15 = vector.load %arg1[%c0_14, %c0_15, %c2, %c0_16] : memref<1x18x18x4xf32, #tpu.memory_space<vmem>>, vector<1x16x16x4xf32>
    %16 = vector.shape_cast %15 : vector<1x16x16x4xf32> to vector<16x16x4xf32>
    %17 = vector.shape_cast %16 : vector<16x16x4xf32> to vector<256x4xf32>
    %c2_17 = arith.constant 2 : index
    %c0_18 = arith.constant 0 : index
    %c0_19 = arith.constant 0 : index
    %18 = vector.load %arg2[%c2_17, %c0_18, %c0_19] : memref<9x4x8xf32, #tpu.memory_space<vmem>>, vector<1x4x8xf32>
    %19 = vector.shape_cast %18 : vector<1x4x8xf32> to vector<4x8xf32>
    %cst_20 = arith.constant dense<0.000000e+00> : vector<256x8xf32>
    %20 = tpu.matmul %17, %19, %cst_20 {dimension_numbers = #tpu.dot_dimension_numbers<[1], [0], [0], [1], [0, 0, 1, 1], [], []>} : vector<256x4xf32>, vector<4x8xf32>, vector<256x8xf32> -> vector<256x8xf32>
    %21 = arith.addf %14, %20 : vector<256x8xf32>
    %c0_21 = arith.constant 0 : index
    %c1_22 = arith.constant 1 : index
    %c0_23 = arith.constant 0 : index
    %c0_24 = arith.constant 0 : index
    %22 = vector.load %arg1[%c0_21, %c1_22, %c0_23, %c0_24] : memref<1x18x18x4xf32, #tpu.memory_space<vmem>>, vector<1x16x16x4xf32>
    %23 = vector.shape_cast %22 : vector<1x16x16x4xf32> to vector<16x16x4xf32>
    %24 = vector.shape_cast %23 : vector<16x16x4xf32> to vector<256x4xf32>
    %c3 = arith.constant 3 : index
    %c0_25 = arith.constant 0 : index
    %c0_26 = arith.constant 0 : index
    %25 = vector.load %arg2[%c3, %c0_25, %c0_26] : memref<9x4x8xf32, #tpu.memory_space<vmem>>, vector<1x4x8xf32>
    %26 = vector.shape_cast %25 : vector<1x4x8xf32> to vector<4x8xf32>
    %cst_27 = arith.constant dense<0.000000e+00> : vector<256x8xf32>
    %27 = tpu.matmul %24, %26, %cst_27 {dimension_numbers = #tpu.dot_dimension_numbers<[1], [0], [0], [1], [0, 0, 1, 1], [], []>} : vector<256x4xf32>, vector<4x8xf32>, vector<256x8xf32> -> vector<256x8xf32>
    %28 = arith.addf %21, %27 : vector<256x8xf32>
    %c0_28 = arith.constant 0 : index
    %c1_29 = arith.constant 1 : index
    %c1_30 = arith.constant 1 : index
    %c0_31 = arith.constant 0 : index
    %29 = vector.load %arg1[%c0_28, %c1_29, %c1_30, %c0_31] : memref<1x18x18x4xf32, #tpu.memory_space<vmem>>, vector<1x16x16x4xf32>
    %30 = vector.shape_cast %29 : vector<1x16x16x4xf32> to vector<16x16x4xf32>
    %31 = vector.shape_cast %30 : vector<16x16x4xf32> to vector<256x4xf32>
    %c4 = arith.constant 4 : index
    %c0_32 = arith.constant 0 : index
    %c0_33 = arith.constant 0 : index
    %32 = vector.load %arg2[%c4, %c0_32, %c0_33] : memref<9x4x8xf32, #tpu.memory_space<vmem>>, vector<1x4x8xf32>
    %33 = vector.shape_cast %32 : vector<1x4x8xf32> to vector<4x8xf32>
    %cst_34 = arith.constant dense<0.000000e+00> : vector<256x8xf32>
    %34 = tpu.matmul %31, %33, %cst_34 {dimension_numbers = #tpu.dot_dimension_numbers<[1], [0], [0], [1], [0, 0, 1, 1], [], []>} : vector<256x4xf32>, vector<4x8xf32>, vector<256x8xf32> -> vector<256x8xf32>
    %35 = arith.addf %28, %34 : vector<256x8xf32>
    %c0_35 = arith.constant 0 : index
    %c1_36 = arith.constant 1 : index
    %c2_37 = arith.constant 2 : index
    %c0_38 = arith.constant 0 : index
    %36 = vector.load %arg1[%c0_35, %c1_36, %c2_37, %c0_38] : memref<1x18x18x4xf32, #tpu.memory_space<vmem>>, vector<1x16x16x4xf32>
    %37 = vector.shape_cast %36 : vector<1x16x16x4xf32> to vector<16x16x4xf32>
    %38 = vector.shape_cast %37 : vector<16x16x4xf32> to vector<256x4xf32>
    %c5 = arith.constant 5 : index
    %c0_39 = arith.constant 0 : index
    %c0_40 = arith.constant 0 : index
    %39 = vector.load %arg2[%c5, %c0_39, %c0_40] : memref<9x4x8xf32, #tpu.memory_space<vmem>>, vector<1x4x8xf32>
    %40 = vector.shape_cast %39 : vector<1x4x8xf32> to vector<4x8xf32>
    %cst_41 = arith.constant dense<0.000000e+00> : vector<256x8xf32>
    %41 = tpu.matmul %38, %40, %cst_41 {dimension_numbers = #tpu.dot_dimension_numbers<[1], [0], [0], [1], [0, 0, 1, 1], [], []>} : vector<256x4xf32>, vector<4x8xf32>, vector<256x8xf32> -> vector<256x8xf32>
    %42 = arith.addf %35, %41 : vector<256x8xf32>
    %c0_42 = arith.constant 0 : index
    %c2_43 = arith.constant 2 : index
    %c0_44 = arith.constant 0 : index
    %c0_45 = arith.constant 0 : index
    %43 = vector.load %arg1[%c0_42, %c2_43, %c0_44, %c0_45] : memref<1x18x18x4xf32, #tpu.memory_space<vmem>>, vector<1x16x16x4xf32>
    %44 = vector.shape_cast %43 : vector<1x16x16x4xf32> to vector<16x16x4xf32>
    %45 = vector.shape_cast %44 : vector<16x16x4xf32> to vector<256x4xf32>
    %c6 = arith.constant 6 : index
    %c0_46 = arith.constant 0 : index
    %c0_47 = arith.constant 0 : index
    %46 = vector.load %arg2[%c6, %c0_46, %c0_47] : memref<9x4x8xf32, #tpu.memory_space<vmem>>, vector<1x4x8xf32>
    %47 = vector.shape_cast %46 : vector<1x4x8xf32> to vector<4x8xf32>
    %cst_48 = arith.constant dense<0.000000e+00> : vector<256x8xf32>
    %48 = tpu.matmul %45, %47, %cst_48 {dimension_numbers = #tpu.dot_dimension_numbers<[1], [0], [0], [1], [0, 0, 1, 1], [], []>} : vector<256x4xf32>, vector<4x8xf32>, vector<256x8xf32> -> vector<256x8xf32>
    %49 = arith.addf %42, %48 : vector<256x8xf32>
    %c0_49 = arith.constant 0 : index
    %c2_50 = arith.constant 2 : index
    %c1_51 = arith.constant 1 : index
    %c0_52 = arith.constant 0 : index
    %50 = vector.load %arg1[%c0_49, %c2_50, %c1_51, %c0_52] : memref<1x18x18x4xf32, #tpu.memory_space<vmem>>, vector<1x16x16x4xf32>
    %51 = vector.shape_cast %50 : vector<1x16x16x4xf32> to vector<16x16x4xf32>
    %52 = vector.shape_cast %51 : vector<16x16x4xf32> to vector<256x4xf32>
    %c7 = arith.constant 7 : index
    %c0_53 = arith.constant 0 : index
    %c0_54 = arith.constant 0 : index
    %53 = vector.load %arg2[%c7, %c0_53, %c0_54] : memref<9x4x8xf32, #tpu.memory_space<vmem>>, vector<1x4x8xf32>
    %54 = vector.shape_cast %53 : vector<1x4x8xf32> to vector<4x8xf32>
    %cst_55 = arith.constant dense<0.000000e+00> : vector<256x8xf32>
    %55 = tpu.matmul %52, %54, %cst_55 {dimension_numbers = #tpu.dot_dimension_numbers<[1], [0], [0], [1], [0, 0, 1, 1], [], []>} : vector<256x4xf32>, vector<4x8xf32>, vector<256x8xf32> -> vector<256x8xf32>
    %56 = arith.addf %49, %55 : vector<256x8xf32>
    %c0_56 = arith.constant 0 : index
    %c2_57 = arith.constant 2 : index
    %c2_58 = arith.constant 2 : index
    %c0_59 = arith.constant 0 : index
    %57 = vector.load %arg1[%c0_56, %c2_57, %c2_58, %c0_59] : memref<1x18x18x4xf32, #tpu.memory_space<vmem>>, vector<1x16x16x4xf32>
    %58 = vector.shape_cast %57 : vector<1x16x16x4xf32> to vector<16x16x4xf32>
    %59 = vector.shape_cast %58 : vector<16x16x4xf32> to vector<256x4xf32>
    %c8 = arith.constant 8 : index
    %c0_60 = arith.constant 0 : index
    %c0_61 = arith.constant 0 : index
    %60 = vector.load %arg2[%c8, %c0_60, %c0_61] : memref<9x4x8xf32, #tpu.memory_space<vmem>>, vector<1x4x8xf32>
    %61 = vector.shape_cast %60 : vector<1x4x8xf32> to vector<4x8xf32>
    %cst_62 = arith.constant dense<0.000000e+00> : vector<256x8xf32>
    %62 = tpu.matmul %59, %61, %cst_62 {dimension_numbers = #tpu.dot_dimension_numbers<[1], [0], [0], [1], [0, 0, 1, 1], [], []>} : vector<256x4xf32>, vector<4x8xf32>, vector<256x8xf32> -> vector<256x8xf32>
    %63 = arith.addf %56, %62 : vector<256x8xf32>
    %c0_63 = arith.constant 0 : index
    %c0_64 = arith.constant 0 : index
    %c0_65 = arith.constant 0 : index
    %64 = vector.load %arg3[%c0_63, %c0_64, %c0_65] : memref<1x256x8xf32, #tpu.memory_space<vmem>>, vector<1x256x8xf32>
    %65 = vector.shape_cast %64 : vector<1x256x8xf32> to vector<256x8xf32>
    %66 = vector.shape_cast %63 : vector<256x8xf32> to vector<1x256x8xf32>
    tpu.vector_store %arg3[%c0_63, %c0_64, %c0_65], %66 {strides = array<i32>} : memref<1x256x8xf32, #tpu.memory_space<vmem>>, vector<1x256x8xf32>,
    %cst_66 = arith.constant dense<0.000000e+00> : vector<8xf32>
    %67 = vector.multi_reduction <add>, %63, %cst_66 [0] : vector<256x8xf32> to vector<8xf32>
    %68 = vector.shape_cast %67 : vector<8xf32> to vector<1x8xf32>
    %69 = arith.mulf %63, %63 : vector<256x8xf32>
    %cst_67 = arith.constant dense<0.000000e+00> : vector<8xf32>
    %70 = vector.multi_reduction <add>, %69, %cst_67 [0] : vector<256x8xf32> to vector<8xf32>
    %71 = vector.shape_cast %70 : vector<8xf32> to vector<1x8xf32>
    %72 = tpu.concatenate %68, %71 in 0 : vector<1x8xf32>, vector<1x8xf32> -> vector<2x8xf32>
    %c0_68 = arith.constant 0 : index
    %c0_69 = arith.constant 0 : index
    %c0_70 = arith.constant 0 : index
    %73 = vector.load %arg4[%c0_68, %c0_69, %c0_70] : memref<1x2x8xf32, #tpu.memory_space<vmem>>, vector<1x2x8xf32>
    %74 = vector.shape_cast %73 : vector<1x2x8xf32> to vector<2x8xf32>
    %75 = vector.shape_cast %72 : vector<2x8xf32> to vector<1x2x8xf32>
    tpu.vector_store %arg4[%c0_68, %c0_69, %c0_70], %75 {strides = array<i32>} : memref<1x2x8xf32, #tpu.memory_space<vmem>>, vector<1x2x8xf32>,
    return
  }
  func.func @transform_0(%arg0: i32) -> (i32, i32, i32, i32) {
    %c0_i32 = arith.constant 0 : i32
    %c0_i32_0 = arith.constant 0 : i32
    %c0_i32_1 = arith.constant 0 : i32
    %c0_i32_2 = arith.constant 0 : i32
    return %arg0, %c0_i32, %c0_i32_0, %c0_i32_1 : i32, i32, i32, i32
  }
  func.func @transform_1(%arg0: i32) -> (i32, i32, i32) {
    %c0_i32 = arith.constant 0 : i32
    %c0_i32_0 = arith.constant 0 : i32
    %c0_i32_1 = arith.constant 0 : i32
    %c0_i32_2 = arith.constant 0 : i32
    return %c0_i32, %c0_i32_0, %c0_i32_1 : i32, i32, i32
  }
  func.func @transform_2(%arg0: i32) -> (i32, i32, i32) {
    %c0_i32 = arith.constant 0 : i32
    %c0_i32_0 = arith.constant 0 : i32
    %c0_i32_1 = arith.constant 0 : i32
    return %arg0, %c0_i32, %c0_i32_0 : i32, i32, i32
  }
  func.func @transform_3(%arg0: i32) -> (i32, i32, i32) {
    %c0_i32 = arith.constant 0 : i32
    %c0_i32_0 = arith.constant 0 : i32
    %c0_i32_1 = arith.constant 0 : i32
    return %arg0, %c0_i32, %c0_i32_0 : i32, i32, i32
  }
}

module attributes {stable_mosaic.version = 11 : i64} {
  func.func @_scale_shift_relu_kernel(%arg0: i32, %arg1: memref<32x128xf32, #tpu.memory_space<vmem>>, %arg2: memref<1x128xf32, #tpu.memory_space<vmem>>, %arg3: memref<1x128xf32, #tpu.memory_space<vmem>>, %arg4: memref<32x128xf32, #tpu.memory_space<vmem>>) attributes {dimension_semantics = [#tpu.dimension_semantics<parallel>], iteration_bounds = array<i64: 1>, scalar_prefetch = 0 : i64, scratch_operands = 0 : i64, tpu.core_type = #tpu.core_type<tc>, window_params = [{transform_indices = @transform_0, window_bounds = array<i64: 32, 128>}, {pipeline_mode = #tpu.pipeline_mode<synchronous>, transform_indices = @transform_1, window_bounds = array<i64: 1, 128>}, {pipeline_mode = #tpu.pipeline_mode<synchronous>, transform_indices = @transform_2, window_bounds = array<i64: 1, 128>}, {transform_indices = @transform_3, window_bounds = array<i64: 32, 128>}]} {
    %c0 = arith.constant 0 : index
    %c0_0 = arith.constant 0 : index
    %0 = vector.load %arg1[%c0, %c0_0] : memref<32x128xf32, #tpu.memory_space<vmem>>, vector<32x128xf32>
    %c0_1 = arith.constant 0 : index
    %c0_2 = arith.constant 0 : index
    %1 = vector.load %arg2[%c0_1, %c0_2] : memref<1x128xf32, #tpu.memory_space<vmem>>, vector<1x128xf32>
    %2 = vector.broadcast %1 : vector<1x128xf32> to vector<32x128xf32>
    %3 = arith.mulf %0, %2 : vector<32x128xf32>
    %c0_3 = arith.constant 0 : index
    %c0_4 = arith.constant 0 : index
    %4 = vector.load %arg3[%c0_3, %c0_4] : memref<1x128xf32, #tpu.memory_space<vmem>>, vector<1x128xf32>
    %5 = vector.broadcast %4 : vector<1x128xf32> to vector<32x128xf32>
    %6 = arith.addf %3, %5 : vector<32x128xf32>
    %cst = arith.constant 0.000000e+00 : f32
    %7 = vector.broadcast %cst : f32 to vector<32x128xf32>
    %8 = arith.maximumf %6, %7 : vector<32x128xf32>
    %c0_5 = arith.constant 0 : index
    %c0_6 = arith.constant 0 : index
    %9 = vector.load %arg4[%c0_5, %c0_6] : memref<32x128xf32, #tpu.memory_space<vmem>>, vector<32x128xf32>
    tpu.vector_store %arg4[%c0_5, %c0_6], %8 {strides = array<i32>} : memref<32x128xf32, #tpu.memory_space<vmem>>, vector<32x128xf32>,
    return
  }
  func.func @transform_0(%arg0: i32) -> (i32, i32) {
    %c0_i32 = arith.constant 0 : i32
    %c0_i32_0 = arith.constant 0 : i32
    return %arg0, %c0_i32 : i32, i32
  }
  func.func @transform_1(%arg0: i32) -> (i32, i32) {
    %c0_i32 = arith.constant 0 : i32
    %c0_i32_0 = arith.constant 0 : i32
    %c0_i32_1 = arith.constant 0 : i32
    return %c0_i32, %c0_i32_0 : i32, i32
  }
  func.func @transform_2(%arg0: i32) -> (i32, i32) {
    %c0_i32 = arith.constant 0 : i32
    %c0_i32_0 = arith.constant 0 : i32
    %c0_i32_1 = arith.constant 0 : i32
    return %c0_i32, %c0_i32_0 : i32, i32
  }
  func.func @transform_3(%arg0: i32) -> (i32, i32) {
    %c0_i32 = arith.constant 0 : i32
    %c0_i32_0 = arith.constant 0 : i32
    return %arg0, %c0_i32 : i32, i32
  }
}

</mosaic_0001>

<bundles_post_ra>
// kernel: tile.18
= control target key start
LH: loop header
LB: loop body
LE: loop exit
PB: predicated region body
PF: predicated region fallthrough
CT: control target
= control target key end

     0   :  { %s28_s0 = inlined_call_operand.vmem [shape: f32[8], index: 0, kind: input, shape index: {}]   ;;  %s29_s1 = inlined_call_operand.vmem [shape: f32[16,8], index: 1, kind: output, shape index: {}]  }
   0x1   :  { %v4_v0 = vld [vmem:[%s28_s0] ss:$0 sm:$0xff] }
   0x2   :  { %5 = vst [vmem:[%s29_s1] sm:$0xff] %v4_v0 }
   0x3   :  { %8 = vst [vmem:[%s29_s1 + $0x8] sm:$0xff] %v4_v0 }

// kernel: tile.19
= control target key start
LH: loop header
LB: loop body
LE: loop exit
PB: predicated region body
PF: predicated region fallthrough
CT: control target
= control target key end

     0   :  { %s131_s10 = smov 120   ;;  %s132_s11 = smov 104   ;;  %vm3_vm0 = vcmask 64512   ;;  %vm9_vm1 = vcmask 1048512   ;;  %vm15_vm2 = vcmask 982912   ;;  %vm21_vm3 = vcmask 917312   ;;  %s207_s0 = inlined_call_operand.vmem [shape: f32[16,8], index: 0, kind: input, shape index: {}]   ;;  %s208_s1 = inlined_call_operand.vmem [shape: f32[1,128], index: 1, kind: output, shape index: {}]  }
   0x1   :  { %v101_v0 = vld [vmem:[%s207_s0 + $0xf] sm:$0x1]   ;;  %v103_v1 = vld [vmem:[%s207_s0 + $0xd] sm:$0x1]   ;;  %v105_v2 = vld [vmem:[%s207_s0 + $0xb] sm:$0x1]  }
   0x2   :  { %7 = vrot.lane.b32.xlu0 %v101_v0, %s131_s10  ;;  %19 = vrot.lane.b32.xlu1 %v103_v1, %s132_s11  ;;  %s133_s14 = smov 88   ;;  %v102_v3 = vld [vmem:[%s207_s0 + $0xe] sm:$0x1]   ;;  %v104_v4 = vld [vmem:[%s207_s0 + $0xc] sm:$0x1]   ;;  %s134_s19 = smov 112  }
   0x3   :  { %31 = vrot.lane.b32.xlu2 %v105_v2, %s133_s14  ;;  %s135_s20 = smov 96   ;;  %v106_v5 = vld [vmem:[%s207_s0 + $0xa] sm:$0x1]   ;;  %s136_s23 = smov 80   ;;  %v107_v6 = vld [vmem:[%s207_s0 + $0x9] sm:$0x1]  }
   0x4   :  { %v108_v7 = vld [vmem:[%s207_s0 + $0x8] sm:$0x1]   ;;  %s137_s28 = smov 72   ;;  %s138_s29 = smov 64   ;;  %v109_v8 = vld [vmem:[%s207_s0 + $0x7] sm:$0x1]  }
   0x5   :  { %s139_s3 = smov 56   ;;  %v110_v9 = vld [vmem:[%s207_s0 + $0x6] sm:$0x1]   ;;  %v111_v10 = vld [vmem:[%s207_s0 + $0x5] sm:$0x1]   ;;  %s140_s8 = smov 48  }
   0x6   :  { %s141_s9 = smov 40   ;;  %v112_v11 = vld [vmem:[%s207_s0 + $0x4] sm:$0x1]   ;;  %s142_s12 = smov 32   ;;  %v113_v12 = vld [vmem:[%s207_s0 + $0x3] sm:$0x1]  }
   0x7   :  { %v114_v13 = vld [vmem:[%s207_s0 + $0x2] sm:$0x1]   ;;  %s143_s17 = smov 24   ;;  %s144_s18 = smov 16   ;;  %v115_v14 = vld [vmem:[%s207_s0 + $0x1] sm:$0x1]  }
   0x8   :  { %s145_s21 = smov 8   ;;  %v2_v15 = vld [vmem:[%s207_s0] sm:$0x1]   ;;  %vm27_vm4 = vcmask 851712   ;;  %vm33_vm5 = vcmask 786112   ;;  %vm39_vm6 = vcmask 720512  }
   0x9   :  { %4 = vst.msk [vmem:[#allocation0] sm:$0x1] %vm3_vm0, %v2_v15   ;;  %vm45_vm7 = vcmask 654912   ;;  %vm51_vm8 = vcmask 589312   ;;  %vm57_vm9 = vcmask 523712   ;;  %vm63_vm10 = vcmask 458112  }
   0xa   :  { %13 = vrot.lane.b32.xlu0 %v102_v3, %s134_s19  ;;  %25 = vrot.lane.b32.xlu1 %v104_v4, %s135_s20  ;;  %vm69_vm11 = vcmask 392512   ;;  %vm75_vm12 = vcmask 326912   ;;  %vm81_vm13 = vcmask 261312   ;;  %vm87_vm14 = vcmask 195712  }
   0xb   :  { %37 = vrot.lane.b32.xlu2 %v106_v5, %s136_s23  ;;  %vm93_vm15 = vcmask 130112  }
  0x12   :  { %43 = vrot.lane.b32.xlu0 %v107_v6, %s137_s28  ;;  %49 = vrot.lane.b32.xlu1 %v108_v7, %s138_s29 }
  0x13   :  { %55 = vrot.lane.b32.xlu2 %v109_v8, %s139_s3 }
  0x1a   :  { %61 = vrot.lane.b32.xlu0 %v110_v9, %s140_s8  ;;  %67 = vrot.lane.b32.xlu1 %v111_v10, %s141_s9 }
  0x1b   :  { %73 = vrot.lane.b32.xlu2 %v112_v11, %s142_s12 }
  0x22   :  { %79 = vrot.lane.b32.xlu0 %v113_v12, %s143_s17  ;;  %85 = vrot.lane.b32.xlu1 %v114_v13, %s144_s18 }
  0x23   :  { %91 = vrot.lane.b32.xlu2 %v115_v14, %s145_s21 }
  0x5d   :  { %v32_v16 = vpop.permute.xlu2 %31  }
  0x65   :  { %v38_v17 = vpop.permute.xlu2 %37  }
  0x6d   :  { %v56_v18 = vpop.permute.xlu2 %55  }
  0x74   :  { %v8_v19 = vpop.permute.xlu0 %7   ;;  %v20_v20 = vpop.permute.xlu1 %19  }
  0x75   :  { %10 = vst.msk [vmem:[#allocation0] sm:$0x1] %vm9_vm1, %v8_v19   ;;  %v74_v21 = vpop.permute.xlu2 %73  }
  0x7c   :  { %v14_v22 = vpop.permute.xlu0 %13   ;;  %v26_v23 = vpop.permute.xlu1 %25  }
  0x7d   :  { %16 = vst.msk [vmem:[#allocation0] sm:$0x1] %vm15_vm2, %v14_v22   ;;  %v92_v24 = vpop.permute.xlu2 %91  }
  0x7e   :  { %22 = vst.msk [vmem:[#allocation0] sm:$0x1] %vm21_vm3, %v20_v20  }
  0x7f   :  { %28 = vst.msk [vmem:[#allocation0] sm:$0x1] %vm27_vm4, %v26_v23  }
  0x80   :  { %34 = vst.msk [vmem:[#allocation0] sm:$0x1] %vm33_vm5, %v32_v16  }
  0x81   :  { %40 = vst.msk [vmem:[#allocation0] sm:$0x1] %vm39_vm6, %v38_v17  }
  0x84   :  { %v44_v25 = vpop.permute.xlu0 %43   ;;  %v50_v26 = vpop.permute.xlu1 %49  }
  0x85   :  { %46 = vst.msk [vmem:[#allocation0] sm:$0x1] %vm45_vm7, %v44_v25  }
  0x86   :  { %52 = vst.msk [vmem:[#allocation0] sm:$0x1] %vm51_vm8, %v50_v26  }
  0x87   :  { %58 = vst.msk [vmem:[#allocation0] sm:$0x1] %vm57_vm9, %v56_v18  }
  0x8c   :  { %v62_v27 = vpop.permute.xlu0 %61   ;;  %v68_v28 = vpop.permute.xlu1 %67  }
  0x8d   :  { %64 = vst.msk [vmem:[#allocation0] sm:$0x1] %vm63_vm10, %v62_v27  }
  0x8e   :  { %70 = vst.msk [vmem:[#allocation0] sm:$0x1] %vm69_vm11, %v68_v28  }
  0x8f   :  { %76 = vst.msk [vmem:[#allocation0] sm:$0x1] %vm75_vm12, %v74_v21  }
  0x94   :  { %v80_v29 = vpop.permute.xlu0 %79   ;;  %v86_v30 = vpop.permute.xlu1 %85  }
  0x95   :  { %82 = vst.msk [vmem:[#allocation0] sm:$0x1] %vm81_vm13, %v80_v29  }
  0x96   :  { %88 = vst.msk [vmem:[#allocation0] sm:$0x1] %vm87_vm14, %v86_v30  }
  0x97   :  { %94 = vst.msk [vmem:[#allocation0] sm:$0x1] %vm93_vm15, %v92_v24  }
  0x9e   :  { %v97_v31 = vld [vmem:[#allocation0] sm:$0x1] }
  0x9f   :  { %100 = vst [vmem:[%s208_s1] sm:$0x1] %v97_v31 }

// kernel: base_conv2d.3
= control target key start
LH: loop header
LB: loop body
LE: loop exit
PB: predicated region body
PF: predicated region fallthrough
CT: control target
= control target key end

     0   :  { %s98_s0 = inlined_call_operand.vmem [shape: f32[32,128], index: 0, kind: input, shape index: {}]   ;;  %s99_s1 = inlined_call_operand.vmem [shape: f32[1,128], index: 1, kind: input, shape index: {}]   ;;  %s100_s2 = inlined_call_operand.vmem [shape: f32[1,128], index: 2, kind: input, shape index: {}]   ;;  %s101_s3 = inlined_call_operand.vmem [shape: f32[32,128], index: 3, kind: output, shape index: {}]  }
   0x1   :  { %v14_v0 = vld [vmem:[%s98_s0] sm:$0xff]  ;;  %v15_v3 = vld [vmem:[%s98_s0 + $0x8] sm:$0xff]  ;;  %v16_v6 = vld [vmem:[%s98_s0 + $0x10] sm:$0xff] }
   0x2   :  { %v46_v1 = vld [vmem:[%s99_s1] ss:$0 sm:$0xff]  ;;  %v17_v7 = vld [vmem:[%s98_s0 + $0x18] sm:$0xff] }
   0x3   :  { %v47_v2 = vld [vmem:[%s100_s2] ss:$0 sm:$0xff]  ;;  %v22_v4 = vmul.f32 %v46_v1, %v14_v0  ;;  %v23_v5 = vmul.f32 %v46_v1, %v15_v3  ;;  %v24_v8 = vmul.f32 %v46_v1, %v16_v6  ;;  %v25_v9 = vmul.f32 %v46_v1, %v17_v7 }
   0x5   :  { %v30_v10 = vadd.f32 %v47_v2, %v22_v4  ;;  %v31_v11 = vadd.f32 %v47_v2, %v23_v5  ;;  %v32_v12 = vadd.f32 %v47_v2, %v24_v8  ;;  %v33_v13 = vadd.f32 %v47_v2, %v25_v9 }
   0x7   :  { %v34_v14 = vmax.f32 %v30_v10, 0.0  ;;  %v35_v15 = vmax.f32 %v31_v11, 0.0  ;;  %v36_v16 = vmax.f32 %v32_v12, 0.0  ;;  %v37_v17 = vmax.f32 %v33_v13, 0.0 }
   0x9   :  { %38 = vst [vmem:[%s101_s3] sm:$0xff] %v34_v14 }
   0xa   :  { %39 = vst [vmem:[%s101_s3 + $0x8] sm:$0xff] %v35_v15 }
   0xb   :  { %40 = vst [vmem:[%s101_s3 + $0x10] sm:$0xff] %v36_v16 }
   0xc   :  { %41 = vst [vmem:[%s101_s3 + $0x18] sm:$0xff] %v37_v17 }

// kernel: base_conv2d.2
= control target key start
LH: loop header
LB: loop body
LE: loop exit
PB: predicated region body
PF: predicated region fallthrough
CT: control target
= control target key end

     0   :  { %s3465_s12 = smov 0   ;;  %s4637_s0 = inlined_call_operand.vmem [shape: f32[2,18,18,4], index: 0, kind: input, shape index: {}]   ;;  %s4638_s1 = inlined_call_operand.vmem [shape: f32[9,4,8], index: 1, kind: input, shape index: {}]   ;;  %s4639_s2 = inlined_call_operand.vmem [shape: f32[2,256,8], index: 2, kind: output, shape index: {0}]   ;;  %s4640_s3 = inlined_call_operand.vmem [shape: f32[2,2,8], index: 3, kind: output, shape index: {1}]  }
   0x1 LB: > { %s2916_s13 = sadd.s32 4294967295, %s3443_s12   ;;  %p2920_p0 = scmp.ge.s32.totalorder %s3443_s12, 1  ;;  %s3443_s12 = sphi %s3465_s12, %s14_s12  }
   0x2   : > { %p140_p1 = scmp.lt.s32.totalorder %s3443_s12, 3 }
   0x4   : > { %p141_p2 = pnand %p2920_p0, %p140_p1 }
   0x6   : > { %144 = sbr.rel (%p141_p2) target bundleno = 744 (0x2e8), region = 28 }
   0xb   : > { %v2925_v0 = vld [vmem:[%s4638_s1 + $0x4] sm:$0xf]  ;;  %vm346_vm0 = vcmask 1043456   ;;  %p168_p3 = scmp.lt.s32.totalorder %s2916_s13, 1  ;;  %v2992_v1 = vld [vmem:[%s4638_s1 + $0x8] sm:$0xf] }
   0xc   : > { %3425 = vmatpush.msk.msra.mxu1 %vm346_vm0, %v2925_v0  ;;  %3426 = vmatpush.msk.msra.mxu2 %vm346_vm0, %v2925_v0  ;;  %v3058_v2 = vld [vmem:[%s4638_s1 + $0xc] sm:$0xf]  ;;  %v214_v3 = vld [vmem:[%s4638_s1] sm:$0xf]  ;;  %v3124_v4 = vld [vmem:[%s4638_s1 + $0x10] sm:$0xf] }
   0xd   : > { %s4740_s13 = smov (!%p168_p3, %s2916_s13), 1  ;;  %3427 = vmatpush.msk.msra.mxu3 %vm346_vm0, %v2925_v0  ;;  %2926 = vmatpush.msk.msra.mxu0 %vm346_vm0, %v2925_v0  ;;  %vm249_vm1 = vcmask 31744   ;;  %v3256_v25 = vld [vmem:[%s4638_s1 + $0x18] sm:$0xf]  ;;  %v3322_v26 = vld [vmem:[%s4638_s1 + $0x1c] sm:$0xf] }
   0xe   : > { %2993 = vmatpush.msk.msrb.mxu2 %vm346_vm0, %v2992_v1  ;;  %2959 = vmatpush.msk.msrb.mxu1 %vm346_vm0, %v214_v3  ;;  %s3428_s24 = smul.u32 432, %s4740_s13  ;;  %v3190_v27 = vld [vmem:[%s4638_s1 + $0x14] sm:$0xf]  ;;  %v3388_v32 = vld [vmem:[%s4638_s1 + $0x20] sm:$0xf]  ;;  %s3424_s9 = sshll.u32 %s4740_s13, 8 }
   0xf   : > { %3059 = vmatpush.msk.msrb.mxu3 %vm346_vm0, %v3058_v2  ;;  %3125 = vmatpush.msk.msrb.mxu0 %vm346_vm0, %v3124_v4  ;;  %s4357_s14 = scalar_lea.vmem %s4639_s2, %s3424_s9  ;;  %vm2623_vm2 = vcmask 64512   ;;  %s2924_s15 = sshll.u32 %s4740_s13, 1  ;;  %vm2826_vm3 = vcmask 1040384   ;;  %vm2828_vm4 = vcmask 58368  }
  0x10   : > { %s3502_s27 = scalar_lea.vmem %s4637_s0, %s3428_s24  ;;  %s181_s18 = scalar_lea.vmem %s4640_s3, %s2924_s15 }
  0x11   : > { %v3505_v5 = vld [vmem:[%s3502_s27 + $0x61] sm:$0xff]  ;;  %v3522_v9 = vld [vmem:[%s3502_s27 + $0x69] sm:$0xff]  ;;  %v3539_v13 = vld [vmem:[%s3502_s27 + $0x79] sm:$0xff] }
  0x12   : > { %v3508_v6 = vld [vmem:[%s3502_s27 + $0xc1] sm:$0xff]  ;;  %2935 = vmatmul.msk.f32.vlgmr.msra.gmra.mxu1 %vm249_vm1, %v3505_v5  ;;  %v3525_v10 = vld [vmem:[%s3502_s27 + $0xc9] sm:$0xff]  ;;  %v3542_v14 = vld [vmem:[%s3502_s27 + $0xd9] sm:$0xff] }
  0x13   : > { %v3511_v7 = vld [vmem:[%s3502_s27 + $0x121] sm:$0xff]  ;;  %2943 = vmatmul.msk.f32.vlgmr.msra.gmra.mxu2 %vm249_vm1, %v3508_v6  ;;  %v3528_v11 = vld [vmem:[%s3502_s27 + $0x129] sm:$0xff]  ;;  %v3545_v15 = vld [vmem:[%s3502_s27 + $0x139] sm:$0xff]  ;;  %3191 = vmatpush.msk.msra.mxu1 %vm346_vm0, %v3190_v27 }
  0x14   : > { %v215_v8 = vld [vmem:[%s3502_s27 + $0x1] sm:$0xff]  ;;  %2951 = vmatmul.msk.f32.vlgmr.msra.gmra.mxu3 %vm249_vm1, %v3511_v7  ;;  %v216_v12 = vld [vmem:[%s3502_s27 + $0x9] sm:$0xff]  ;;  %v217_v16 = vld [vmem:[%s3502_s27 + $0x19] sm:$0xff]  ;;  %3257 = vmatpush.msk.msra.mxu2 %vm346_vm0, %v3256_v25 }
  0x15   : > { %2927 = vmatmul.msk.f32.vlgmr.msra.gmra.mxu0 %vm249_vm1, %v215_v8  ;;  %v3556_v17 = vld [vmem:[%s3502_s27 + $0x81] sm:$0xff]  ;;  %v3573_v21 = vld [vmem:[%s3502_s27 + $0x91] sm:$0xff]  ;;  %3323 = vmatpush.msk.msra.mxu3 %vm346_vm0, %v3322_v26  ;;  %v3605_v28 = vld [vmem:[%s3502_s27 + $0x99] sm:$0xff] }
  0x16   : > { %v3559_v18 = vld [vmem:[%s3502_s27 + $0xe1] sm:$0xff]  ;;  %v3576_v22 = vld [vmem:[%s3502_s27 + $0xf1] sm:$0xff]  ;;  %v3608_v29 = vld [vmem:[%s3502_s27 + $0xf9] sm:$0xff]  ;;  %3389 = vmatpush.msk.msra.mxu0 %vm346_vm0, %v3388_v32 }
  0x17   : > { %v3562_v19 = vld [vmem:[%s3502_s27 + $0x141] sm:$0xff]  ;;  %v3579_v23 = vld [vmem:[%s3502_s27 + $0x151] sm:$0xff]  ;;  %v3611_v30 = vld [vmem:[%s3502_s27 + $0x159] sm:$0xff] }
  0x18   : > { %v218_v20 = vld [vmem:[%s3502_s27 + $0x21] sm:$0xff]  ;;  %v3582_v24 = vld [vmem:[%s3502_s27 + $0x31] sm:$0xff]  ;;  %v3614_v31 = vld [vmem:[%s3502_s27 + $0x39] sm:$0xff] }
  0x19   : > { %v3629_v33 = vld [vmem:[%s3502_s27 + $0xa9] sm:$0xff]  ;;  %v3649_v37 = vld [vmem:[%s3502_s27 + $0xb1] sm:$0xff]  ;;  %v182_v41 = vld [vmem:[%s3502_s27] sm:$0xff] }
  0x1a   : > { %2936 = vmatmul.msk.f32.gmra.mxu1 %vm249_vm1, %v3522_v9  ;;  %v3632_v34 = vld [vmem:[%s3502_s27 + $0x109] sm:$0xff]  ;;  %v3652_v38 = vld [vmem:[%s3502_s27 + $0x111] sm:$0xff]  ;;  %v3027_v46 = vld [vmem:[%s3502_s27 + $0x20] sm:$0xff] }
  0x1b   : > { %2944 = vmatmul.msk.f32.gmra.mxu2 %vm249_vm1, %v3525_v10  ;;  %v3635_v35 = vld [vmem:[%s3502_s27 + $0x169] sm:$0xff]  ;;  %v3655_v39 = vld [vmem:[%s3502_s27 + $0x171] sm:$0xff]  ;;  %v3683_v47 = vld [vmem:[%s3502_s27 + $0x1a] sm:$0xff] }
  0x1c   : > { %2952 = vmatmul.msk.f32.gmra.mxu3 %vm249_vm1, %v3528_v11  ;;  %v3638_v36 = vld [vmem:[%s3502_s27 + $0x49] sm:$0xff]  ;;  %v3658_v40 = vld [vmem:[%s3502_s27 + $0x51] sm:$0xff]  ;;  %v3723_v53 = vld [vmem:[%s3502_s27 + $0x3a] sm:$0xff] }
  0x1d   : > { %2928 = vmatmul.msk.f32.gmra.mxu0 %vm249_vm1, %v216_v12  ;;  %v675_v42 = vld [vmem:[%s3502_s27 + $0x2] sm:$0xff]  ;;  %v3026_v43 = vld [vmem:[%s3502_s27 + $0x18] sm:$0xff]  ;;  %v676_v45 = vld [vmem:[%s3502_s27 + $0xa] sm:$0xff] }
  0x1e   : > { %v183_v44 = vld [vmem:[%s3502_s27 + $0x8] sm:$0xff]  ;;  %v3686_v48 = vld [vmem:[%s3502_s27 + $0x30] sm:$0xff]  ;;  %v3699_v50 = vld [vmem:[%s3502_s27 + $0x38] sm:$0xff] }
  0x1f   : > { %v3696_v49 = vld [vmem:[%s3502_s27 + $0x22] sm:$0xff]  ;;  %v3709_v51 = vld [vmem:[%s3502_s27 + $0x32] sm:$0xff]  ;;  %v3737_v55 = vld [vmem:[%s3502_s27 + $0x4a] sm:$0xff] }
  0x20   : > { %v3712_v52 = vld [vmem:[%s3502_s27 + $0x48] sm:$0xff]  ;;  %v3726_v54 = vld [vmem:[%s3502_s27 + $0x50] sm:$0xff]  ;;  %v3740_v56 = vld [vmem:[%s3502_s27 + $0x60] sm:$0xff] }
  0x21   : > { %v3751_v57 = vld [vmem:[%s3502_s27 + $0x52] sm:$0xff]  ;;  %v3754_v58 = vld [vmem:[%s3502_s27 + $0x68] sm:$0xff]  ;;  %v3792_v3 = vld [vmem:[%s3502_s27 + $0x80] sm:$0xff] }
  0x22   : > { %2937 = vmatmul.msk.f32.gmra.mxu1 %vm249_vm1, %v3539_v13  ;;  %4665 = vst [vmem:[#allocation2_spill] sm:$0xff] %v3754_v58  ;;  %v3767_v60 = vld [vmem:[%s3502_s27 + $0x62] sm:$0xff]  ;;  %v3770_v61 = vld [vmem:[%s3502_s27 + $0x78] sm:$0xff]  ;;  %v3789_v2 = vld [vmem:[%s3502_s27 + $0x6a] sm:$0xff] }
  0x23   : > { %2945 = vmatmul.msk.f32.gmra.mxu2 %vm249_vm1, %v3542_v14  ;;  %4666 = vst [vmem:[#allocation3_spill] sm:$0xff] %v3770_v61  ;;  %v3811_v12 = vld [vmem:[%s3502_s27 + $0x7a] sm:$0xff]  ;;  %v3833_v26 = vld [vmem:[%s3502_s27 + $0x82] sm:$0xff] }
  0x24   : > { %2953 = vmatmul.msk.f32.gmra.mxu3 %vm249_vm1, %v3545_v15  ;;  %4668 = vst [vmem:[#allocation5_spill] sm:$0xff] %v3789_v2  ;;  %v3836_v27 = vld [vmem:[%s3502_s27 + $0x98] sm:$0xff] }
  0x25   : > { %2929 = vmatmul.msk.f32.gmra.mxu0 %vm249_vm1, %v217_v16  ;;  %4669 = vst [vmem:[#allocation6_spill] sm:$0xff] %v3792_v3 }
  0x26   : > { %4671 = vst [vmem:[#allocation8_spill] sm:$0xff] %v3811_v12 }
  0x27   : > { %4674 = vst [vmem:[#allocation11_spill] sm:$0xff] %v3833_v26 }
  0x28   : > { %4675 = vst [vmem:[#allocation12_spill] sm:$0xff] %v3836_v27 }
  0x2a   : > { %2938 = vmatmul.msk.f32.gmra.mxu1 %vm249_vm1, %v3556_v17 }
  0x2b   : > { %2946 = vmatmul.msk.f32.gmra.mxu2 %vm249_vm1, %v3559_v18 }
  0x2c   : > { %2954 = vmatmul.msk.f32.gmra.mxu3 %vm249_vm1, %v3562_v19 }
  0x2d   : > { %2930 = vmatmul.msk.f32.gmra.mxu0 %vm249_vm1, %v218_v20 }
  0x32   : > { %2939 = vmatmul.msk.f32.gmra.mxu1 %vm249_vm1, %v3573_v21 }
  0x33   : > { %2947 = vmatmul.msk.f32.gmra.mxu2 %vm249_vm1, %v3576_v22 }
  0x34   : > { %2955 = vmatmul.msk.f32.gmra.mxu3 %vm249_vm1, %v3579_v23 }
  0x35   : > { %2931 = vmatmul.msk.f32.gmra.mxu0 %vm249_vm1, %v3582_v24 }
  0x3a   : > { %2940 = vmatmul.msk.f32.gmra.mxu1 %vm249_vm1, %v3605_v28 }
  0x3b   : > { %2948 = vmatmul.msk.f32.gmra.mxu2 %vm249_vm1, %v3608_v29 }
  0x3c   : > { %2956 = vmatmul.msk.f32.gmra.mxu3 %vm249_vm1, %v3611_v30 }
  0x3d   : > { %2932 = vmatmul.msk.f32.gmra.mxu0 %vm249_vm1, %v3614_v31 }
  0x42   : > { %2941 = vmatmul.msk.f32.gmra.mxu1 %vm249_vm1, %v3629_v33 }
  0x43   : > { %2949 = vmatmul.msk.f32.gmra.mxu2 %vm249_vm1, %v3632_v34 }
  0x44   : > { %2957 = vmatmul.msk.f32.gmra.mxu3 %vm249_vm1, %v3635_v35 }
  0x45   : > { %2933 = vmatmul.msk.f32.gmra.mxu0 %vm249_vm1, %v3638_v36 }
  0x4a   : > { %2942 = vmatmul.msk.f32.gmra.mxu1 %vm249_vm1, %v3649_v37 }
  0x4b   : > { %2950 = vmatmul.msk.f32.gmra.mxu2 %vm249_vm1, %v3652_v38 }
  0x4c   : > { %2958 = vmatmul.msk.f32.gmra.mxu3 %vm249_vm1, %v3655_v39 }
  0x4d   : > { %2934 = vmatmul.msk.f32.gmra.mxu0 %vm249_vm1, %v3658_v40 }
  0x52   : > { %2960 = vmatmul.msk.f32.vlgmr.msrb.gmra.mxu1 %vm249_vm1, %v182_v41 }
  0x53   : > { %2994 = vmatmul.msk.f32.vlgmr.msrb.gmra.mxu2 %vm249_vm1, %v675_v42 }
  0x54   : > { %3060 = vmatmul.msk.f32.vlgmr.msrb.gmra.mxu3 %vm249_vm1, %v3026_v43 }
  0x55   : > { %3126 = vmatmul.msk.f32.vlgmr.msrb.gmra.mxu0 %vm249_vm1, %v217_v16 }
  0x5a   : > { %2961 = vmatmul.msk.f32.gmra.mxu1 %vm249_vm1, %v183_v44  ;;  %v3858_v44 = vld [vmem:[%s3502_s27 + $0xa8] sm:$0xff] }
  0x5b   : > { %2995 = vmatmul.msk.f32.gmra.mxu2 %vm249_vm1, %v676_v45  ;;  %4678 = vst [vmem:[#allocation15_spill] sm:$0xff] %v3858_v44 }
  0x5c   : > { %3061 = vmatmul.msk.f32.gmra.mxu3 %vm249_vm1, %v3027_v46 }
  0x5d   : > { %3127 = vmatmul.msk.f32.gmra.mxu0 %vm249_vm1, %v218_v20 }
  0x62   : > { %2962 = vmatmul.msk.f32.gmra.mxu1 %vm249_vm1, %v3026_v43  ;;  %v3855_v43 = vld [vmem:[%s3502_s27 + $0x92] sm:$0xff] }
  0x63   : > { %2996 = vmatmul.msk.f32.gmra.mxu2 %vm249_vm1, %v3683_v47  ;;  %4677 = vst [vmem:[#allocation14_spill] sm:$0xff] %v3855_v43 }
  0x64   : > { %3062 = vmatmul.msk.f32.gmra.mxu3 %vm249_vm1, %v3686_v48 }
  0x65   : > { %3128 = vmatmul.msk.f32.gmra.mxu0 %vm249_vm1, %v3582_v24 }
  0x6a   : > { %2963 = vmatmul.msk.f32.gmra.mxu1 %vm249_vm1, %v3027_v46 }
  0x6b   : > { %2997 = vmatmul.msk.f32.gmra.mxu2 %vm249_vm1, %v3696_v49 }
  0x6c   : > { %3063 = vmatmul.msk.f32.gmra.mxu3 %vm249_vm1, %v3699_v50 }
  0x6d   : > { %3129 = vmatmul.msk.f32.gmra.mxu0 %vm249_vm1, %v3614_v31 }
  0x72   : > { %2964 = vmatmul.msk.f32.gmra.mxu1 %vm249_vm1, %v3686_v48 }
  0x73   : > { %2998 = vmatmul.msk.f32.gmra.mxu2 %vm249_vm1, %v3709_v51 }
  0x74   : > { %3064 = vmatmul.msk.f32.gmra.mxu3 %vm249_vm1, %v3712_v52 }
  0x75   : > { %3130 = vmatmul.msk.f32.gmra.mxu0 %vm249_vm1, %v3638_v36 }
  0x7a   : > { %2965 = vmatmul.msk.f32.gmra.mxu1 %vm249_vm1, %v3699_v50 }
  0x7b   : > { %2999 = vmatmul.msk.f32.gmra.mxu2 %vm249_vm1, %v3723_v53 }
  0x7c   : > { %3065 = vmatmul.msk.f32.gmra.mxu3 %vm249_vm1, %v3726_v54 }
  0x7d   : > { %3131 = vmatmul.msk.f32.gmra.mxu0 %vm249_vm1, %v3658_v40 }
  0x82   : > { %2966 = vmatmul.msk.f32.gmra.mxu1 %vm249_vm1, %v3712_v52 }
  0x83   : > { %3000 = vmatmul.msk.f32.gmra.mxu2 %vm249_vm1, %v3737_v55 }
  0x84   : > { %3066 = vmatmul.msk.f32.gmra.mxu3 %vm249_vm1, %v3740_v56 }
  0x85   : > { %3132 = vmatmul.msk.f32.gmra.mxu0 %vm249_vm1, %v3505_v5 }
  0x8a   : > { %2967 = vmatmul.msk.f32.gmra.mxu1 %vm249_vm1, %v3726_v54 }
  0x8b   : > { %3001 = vmatmul.msk.f32.gmra.mxu2 %vm249_vm1, %v3751_v57 }
  0x8c   : > { %3067 = vmatmul.msk.f32.gmra.mxu3 %vm249_vm1, %v3754_v58 }
  0x8d   : > { %3133 = vmatmul.msk.f32.gmra.mxu0 %vm249_vm1, %v3522_v9 }
  0x8f   : > { %v3764_v59 = vpop.f32.mrf.mxu1 }
  0x92   : > { %v3772_v62 = vpop.f32.mrf.mxu0  ;;  %2968 = vmatmul.msk.f32.gmra.mxu1 %vm249_vm1, %v3740_v56 }
  0x93   : > { %3002 = vmatmul.msk.f32.gmra.mxu2 %vm249_vm1, %v3767_v60 }
  0x94   : > { %3068 = vmatmul.msk.f32.gmra.mxu3 %vm249_vm1, %v3770_v61 }
  0x95   : > { %3134 = vmatmul.msk.f32.gmra.mxu0 %vm249_vm1, %v3539_v13  ;;  %v3814_v13 = vld [vmem:[%s3502_s27 + $0x90] sm:$0xff] }
  0x96   : > { %v3782_v63 = vpop.f32.mrf.mxu2  ;;  %4672 = vst [vmem:[#allocation9_spill] sm:$0xff] %v3814_v13 }
  0x97   : > { %v3784_v0 = vpop.f32.mrf.mxu3  ;;  %v3786_v1 = vpop.f32.mrf.mxu1 }
  0x98   : > { %4667 = vst [vmem:[#allocation4_spill] sm:$0xff] %v3784_v0 }
  0x9a   : > { %v3794_v4 = vpop.f32.mrf.mxu0  ;;  %2969 = vmatmul.msk.f32.gmra.mxu1 %vm249_vm1, %v3754_v58  ;;  %v3959_v58 = vld [vmem:[%s3502_s27 + $0xe0] sm:$0xff] }
  0x9b   : > { %3003 = vmatmul.msk.f32.gmra.mxu2 %vm249_vm1, %v3789_v2  ;;  %v3956_v2 = vld [vmem:[%s3502_s27 + $0xca] sm:$0xff] }
  0x9c   : > { %3069 = vmatmul.msk.f32.gmra.mxu3 %vm249_vm1, %v3792_v3 }
  0x9d   : > { %3135 = vmatmul.msk.f32.gmra.mxu0 %vm249_vm1, %v3556_v17 }
  0x9e   : > { %v3804_v5 = vpop.f32.mrf.mxu2 }
  0x9f   : > { %v3806_v8 = vpop.f32.mrf.mxu3  ;;  %v3808_v9 = vpop.f32.mrf.mxu1 }
  0xa0   : > { %4670 = vst [vmem:[#allocation7_spill] sm:$0xff] %v3806_v8  ;;  %v3880_v8 = vld [vmem:[%s3502_s27 + $0xb0] sm:$0xff] }
  0xa1   : > { %4682 = vst [vmem:[#allocation19_spill] sm:$0xff] %v3880_v8 }
  0xa2   : > { %v3816_v16 = vpop.f32.mrf.mxu0  ;;  %2970 = vmatmul.msk.f32.gmra.mxu1 %vm249_vm1, %v3770_v61  ;;  %v3944_v61 = vld [vmem:[%s3502_s27 + $0xd8] sm:$0xff] }
  0xa3   : > { %3004 = vmatmul.msk.f32.gmra.mxu2 %vm249_vm1, %v3811_v12 }
  0xa4   : > { %3070 = vmatmul.msk.f32.gmra.mxu3 %vm249_vm1, %v3814_v13 }
  0xa5   : > { %3136 = vmatmul.msk.f32.gmra.mxu0 %vm249_vm1, %v3573_v21 }
  0xa6   : > { %v3826_v17 = vpop.f32.mrf.mxu2 }
  0xa7   : > { %v3828_v20 = vpop.f32.mrf.mxu3  ;;  %v3830_v25 = vpop.f32.mrf.mxu1 }
  0xa8   : > { %4673 = vst [vmem:[#allocation10_spill] sm:$0xff] %v3828_v20  ;;  %v3877_v20 = vld [vmem:[%s3502_s27 + $0x9a] sm:$0xff] }
  0xa9   : > { %4681 = vst [vmem:[#allocation18_spill] sm:$0xff] %v3877_v20 }
  0xaa   : > { %v3838_v32 = vpop.f32.mrf.mxu0  ;;  %2971 = vmatmul.msk.f32.gmra.mxu1 %vm249_vm1, %v3792_v3  ;;  %v3921_v3 = vld [vmem:[%s3502_s27 + $0xb2] sm:$0xff] }
  0xab   : > { %3005 = vmatmul.msk.f32.gmra.mxu2 %vm249_vm1, %v3833_v26  ;;  %4689 = vst [vmem:[#allocation26_spill] sm:$0xff] %v3921_v3 }
  0xac   : > { %3071 = vmatmul.msk.f32.gmra.mxu3 %vm249_vm1, %v3836_v27 }
  0xad   : > { %3137 = vmatmul.msk.f32.gmra.mxu0 %vm249_vm1, %v3605_v28 }
  0xae   : > { %v3848_v21 = vpop.f32.mrf.mxu2 }
  0xaf   : > { %v3850_v41 = vpop.f32.mrf.mxu3  ;;  %v3852_v42 = vpop.f32.mrf.mxu1 }
  0xb0   : > { %4676 = vst [vmem:[#allocation13_spill] sm:$0xff] %v3850_v41 }
  0xb2   : > { %v3860_v45 = vpop.f32.mrf.mxu0  ;;  %2972 = vmatmul.msk.f32.gmra.mxu1 %vm249_vm1, %v3814_v13  ;;  %v3899_v13 = vld [vmem:[%s3502_s27 + $0xaa] sm:$0xff] }
  0xb3   : > { %3006 = vmatmul.msk.f32.gmra.mxu2 %vm249_vm1, %v3855_v43  ;;  %4685 = vst [vmem:[#allocation22_spill] sm:$0xff] %v3899_v13 }
  0xb4   : > { %3072 = vmatmul.msk.f32.gmra.mxu3 %vm249_vm1, %v3858_v44 }
  0xb5   : > { %3138 = vmatmul.msk.f32.gmra.mxu0 %vm249_vm1, %v3629_v33 }
  0xb6   : > { %v3870_v28 = vpop.f32.mrf.mxu2 }
  0xb7   : > { %4679 = vst [vmem:[#allocation16_spill] sm:$0xff] %v3870_v28  ;;  %v3872_v46 = vpop.f32.mrf.mxu3  ;;  %v3874_v41 = vpop.f32.mrf.mxu1 }
  0xb8   : > { %4680 = vst [vmem:[#allocation17_spill] sm:$0xff] %v3872_v46 }
  0xba   : > { %v3882_v0 = vpop.f32.mrf.mxu0  ;;  %2973 = vmatmul.msk.f32.gmra.mxu1 %vm249_vm1, %v3836_v27  ;;  %v3902_v27 = vld [vmem:[%s3502_s27 + $0xc0] sm:$0xff] }
  0xbb   : > { %3007 = vmatmul.msk.f32.gmra.mxu2 %vm249_vm1, %v3877_v20  ;;  %4686 = vst [vmem:[#allocation23_spill] sm:$0xff] %v3902_v27 }
  0xbc   : > { %3073 = vmatmul.msk.f32.gmra.mxu3 %vm249_vm1, %v3880_v8 }
  0xbd   : > { %3139 = vmatmul.msk.f32.gmra.mxu0 %vm249_vm1, %v3649_v37 }
  0xbe   : > { %v3892_v33 = vpop.f32.mrf.mxu2 }
  0xbf   : > { %4683 = vst [vmem:[#allocation20_spill] sm:$0xff] %v3892_v33  ;;  %v3894_v46 = vpop.f32.mrf.mxu3  ;;  %v3896_v43 = vpop.f32.mrf.mxu1 }
  0xc0   : > { %4684 = vst [vmem:[#allocation21_spill] sm:$0xff] %v3894_v46 }
  0xc2   : > { %v3904_v26 = vpop.f32.mrf.mxu0  ;;  %2974 = vmatmul.msk.f32.gmra.mxu1 %vm249_vm1, %v3858_v44  ;;  %v3924_v44 = vld [vmem:[%s3502_s27 + $0xc8] sm:$0xff] }
  0xc3   : > { %3008 = vmatmul.msk.f32.gmra.mxu2 %vm249_vm1, %v3899_v13 }
  0xc4   : > { %3074 = vmatmul.msk.f32.gmra.mxu3 %vm249_vm1, %v3902_v27 }
  0xc5   : > { %3140 = vmatmul.msk.f32.gmra.mxu0 %vm249_vm1, %v3508_v6 }
  0xc6   : > { %v3914_v37 = vpop.f32.mrf.mxu2 }
  0xc7   : > { %4687 = vst [vmem:[#allocation24_spill] sm:$0xff] %v3914_v37  ;;  %v3916_v46 = vpop.f32.mrf.mxu3  ;;  %v3918_v20 = vpop.f32.mrf.mxu1  ;;  %v3941_v37 = vld [vmem:[%s3502_s27 + $0xc2] sm:$0xff] }
  0xc8   : > { %4688 = vst [vmem:[#allocation25_spill] sm:$0xff] %v3916_v46 }
  0xc9   : > { %4692 = vst [vmem:[#allocation29_spill] sm:$0xff] %v3941_v37 }
  0xca   : > { %v3926_v12 = vpop.f32.mrf.mxu0  ;;  %2975 = vmatmul.msk.f32.gmra.mxu1 %vm249_vm1, %v3880_v8 }
  0xcb   : > { %3009 = vmatmul.msk.f32.gmra.mxu2 %vm249_vm1, %v3921_v3 }
  0xcc   : > { %3075 = vmatmul.msk.f32.gmra.mxu3 %vm249_vm1, %v3924_v44 }
  0xcd   : > { %3141 = vmatmul.msk.f32.gmra.mxu0 %vm249_vm1, %v3525_v10 }
  0xce   : > { %v3936_v6 = vpop.f32.mrf.mxu2 }
  0xcf   : > { %4690 = vst [vmem:[#allocation27_spill] sm:$0xff] %v3936_v6  ;;  %v3938_v46 = vpop.f32.mrf.mxu3  ;;  %v579_v13 = vpop.f32.mrf.mxu1 }
  0xd0   : > { %4691 = vst [vmem:[#allocation28_spill] sm:$0xff] %v3938_v46  ;;  %v580_v10 = vadd.f32 %v579_v13, %v3772_v62 }
  0xd2   : > { %v1382_v8 = vpop.f32.mrf.mxu0  ;;  %2976 = vmatmul.msk.f32.gmra.mxu1 %vm249_vm1, %v3902_v27 }
  0xd3   : > { %3010 = vmatmul.msk.f32.gmra.mxu2 %vm249_vm1, %v3941_v37 }
  0xd4   : > { %3076 = vmatmul.msk.f32.gmra.mxu3 %vm249_vm1, %v3944_v61 }
  0xd5   : > { %3142 = vmatmul.msk.f32.gmra.mxu0 %vm249_vm1, %v3542_v14 }
  0xd6   : > { %v825_v46 = vpop.f32.mrf.mxu2 }
  0xd7   : > { %v921_v3 = vadd.f32 %v825_v46, %v580_v10  ;;  %v1104_v6 = vpop.f32.mrf.mxu3  ;;  %v582_v33 = vpop.f32.mrf.mxu1 }
  0xd8   : > { %v583_v14 = vadd.f32 %v582_v33, %v3794_v4 }
  0xd9   : > { %v1200_v27 = vadd.f32 %v1104_v6, %v921_v3  ;;  %v3976_v6 = vld [vmem:[%s3502_s27 + $0xf0] sm:$0xff] }
  0xda   : > { %v1385_v37 = vpop.f32.mrf.mxu0  ;;  %2977 = vmatmul.msk.f32.gmra.mxu1 %vm249_vm1, %v3924_v44 }
  0xdb   : > { %v3961_v28 = vadd.f32 %v1382_v8, %v1200_v27  ;;  %3011 = vmatmul.msk.f32.gmra.mxu2 %vm249_vm1, %v3956_v2  ;;  %v3973_v27 = vld [vmem:[%s3502_s27 + $0xda] sm:$0xff] }
  0xdc   : > { %3077 = vmatmul.msk.f32.gmra.mxu3 %vm249_vm1, %v3959_v58 }
  0xdd   : > { %4693 = vst [vmem:[#allocation30_spill] sm:$0xff] %v3961_v28  ;;  %3143 = vmatmul.msk.f32.gmra.mxu0 %vm249_vm1, %v3559_v18 }
  0xde   : > { %v828_v62 = vpop.f32.mrf.mxu2 }
  0xdf   : > { %v922_v3 = vadd.f32 %v828_v62, %v583_v14  ;;  %v1107_v13 = vpop.f32.mrf.mxu3  ;;  %v585_v8 = vpop.f32.mrf.mxu1  ;;  %v3990_v62 = vld [vmem:[%s3502_s27 + $0xe2] sm:$0xff] }
  0xe0   : > { %v586_v18 = vadd.f32 %v585_v8, %v3816_v16 }
  0xe1   : > { %v1201_v46 = vadd.f32 %v1107_v13, %v922_v3  ;;  %v3993_v13 = vld [vmem:[%s3502_s27 + $0xf8] sm:$0xff] }
  0xe2   : > { %v1388_v10 = vpop.f32.mrf.mxu0  ;;  %2978 = vmatmul.msk.f32.gmra.mxu1 %vm249_vm1, %v3944_v61 }
  0xe3   : > { %v3978_v28 = vadd.f32 %v1385_v37, %v1201_v46  ;;  %3012 = vmatmul.msk.f32.gmra.mxu2 %vm249_vm1, %v3973_v27 }
  0xe4   : > { %3078 = vmatmul.msk.f32.gmra.mxu3 %vm249_vm1, %v3976_v6 }
  0xe5   : > { %4694 = vst [vmem:[#allocation31_spill] sm:$0xff] %v3978_v28  ;;  %3144 = vmatmul.msk.f32.gmra.mxu0 %vm249_vm1, %v3576_v22 }
  0xe6   : > { %v831_v4 = vpop.f32.mrf.mxu2 }
  0xe7   : > { %v923_v33 = vadd.f32 %v831_v4, %v586_v18  ;;  %v1110_v14 = vpop.f32.mrf.mxu3  ;;  %v588_v37 = vpop.f32.mrf.mxu1  ;;  %v4007_v4 = vld [vmem:[%s3502_s27 + $0xf2] sm:$0xff] }
  0xe8   : > { %v589_v22 = vadd.f32 %v588_v37, %v3838_v32 }
  0xe9   : > { %v1202_v3 = vadd.f32 %v1110_v14, %v923_v33  ;;  %v4010_v14 = vld [vmem:[%s3502_s27 + $0x108] sm:$0xff] }
  0xea   : > { %v1391_v46 = vpop.f32.mrf.mxu0  ;;  %2979 = vmatmul.msk.f32.gmra.mxu1 %vm249_vm1, %v3959_v58 }
  0xeb   : > { %v3995_v28 = vadd.f32 %v1388_v10, %v1202_v3  ;;  %3013 = vmatmul.msk.f32.gmra.mxu2 %vm249_vm1, %v3990_v62 }
  0xec   : > { %3079 = vmatmul.msk.f32.gmra.mxu3 %vm249_vm1, %v3993_v13 }
  0xed   : > { %4695 = vst [vmem:[#allocation32_spill] sm:$0xff] %v3995_v28  ;;  %3145 = vmatmul.msk.f32.gmra.mxu0 %vm249_vm1, %v3608_v29 }
  0xee   : > { %v834_v16 = vpop.f32.mrf.mxu2 }
  0xef   : > { %v924_v8 = vadd.f32 %v834_v16, %v589_v22  ;;  %v1113_v18 = vpop.f32.mrf.mxu3  ;;  %v591_v10 = vpop.f32.mrf.mxu1  ;;  %v4024_v16 = vld [vmem:[%s3502_s27 + $0xfa] sm:$0xff] }
  0xf0   : > { %v592_v29 = vadd.f32 %v591_v10, %v3860_v45 }
  0xf1   : > { %v1203_v33 = vadd.f32 %v1113_v18, %v924_v8  ;;  %v4027_v18 = vld [vmem:[%s3502_s27 + $0x110] sm:$0xff] }
  0xf2   : > { %v1394_v3 = vpop.f32.mrf.mxu0  ;;  %2980 = vmatmul.msk.f32.gmra.mxu1 %vm249_vm1, %v3976_v6 }
  0xf3   : > { %v4012_v28 = vadd.f32 %v1391_v46, %v1203_v33  ;;  %3014 = vmatmul.msk.f32.gmra.mxu2 %vm249_vm1, %v4007_v4 }
  0xf4   : > { %3080 = vmatmul.msk.f32.gmra.mxu3 %vm249_vm1, %v4010_v14 }
  0xf5   : > { %4696 = vst [vmem:[#allocation33_spill] sm:$0xff] %v4012_v28  ;;  %3146 = vmatmul.msk.f32.gmra.mxu0 %vm249_vm1, %v3632_v34 }
  0xf6   : > { %v837_v32 = vpop.f32.mrf.mxu2 }
  0xf7   : > { %v925_v37 = vadd.f32 %v837_v32, %v592_v29  ;;  %v1116_v22 = vpop.f32.mrf.mxu3  ;;  %v594_v46 = vpop.f32.mrf.mxu1  ;;  %v4041_v32 = vld [vmem:[%s3502_s27 + $0x10a] sm:$0xff] }
  0xf8   : > { %v595_v34 = vadd.f32 %v594_v46, %v3882_v0 }
  0xf9   : > { %v1204_v8 = vadd.f32 %v1116_v22, %v925_v37  ;;  %v4044_v22 = vld [vmem:[%s3502_s27 + $0x120] sm:$0xff] }
  0xfa   : > { %v1397_v33 = vpop.f32.mrf.mxu0  ;;  %2981 = vmatmul.msk.f32.gmra.mxu1 %vm249_vm1, %v3993_v13 }
  0xfb   : > { %v4029_v28 = vadd.f32 %v1394_v3, %v1204_v8  ;;  %3015 = vmatmul.msk.f32.gmra.mxu2 %vm249_vm1, %v4024_v16 }
  0xfc   : > { %3081 = vmatmul.msk.f32.gmra.mxu3 %vm249_vm1, %v4027_v18 }
  0xfd   : > { %4697 = vst [vmem:[#allocation34_spill] sm:$0xff] %v4029_v28  ;;  %3147 = vmatmul.msk.f32.gmra.mxu0 %vm249_vm1, %v3652_v38 }
  0xfe   : > { %v840_v45 = vpop.f32.mrf.mxu2 }
  0xff   : > { %v926_v10 = vadd.f32 %v840_v45, %v595_v34  ;;  %v1119_v29 = vpop.f32.mrf.mxu3  ;;  %v597_v3 = vpop.f32.mrf.mxu1  ;;  %v4058_v45 = vld [vmem:[%s3502_s27 + $0x112] sm:$0xff] }
 0x100   : > { %v598_v38 = vadd.f32 %v597_v3, %v3904_v26 }
 0x101   : > { %v1205_v37 = vadd.f32 %v1119_v29, %v926_v10  ;;  %v4061_v29 = vld [vmem:[%s3502_s27 + $0x128] sm:$0xff] }
 0x102   : > { %v1400_v8 = vpop.f32.mrf.mxu0  ;;  %2982 = vmatmul.msk.f32.gmra.mxu1 %vm249_vm1, %v4010_v14 }
 0x103   : > { %v4046_v28 = vadd.f32 %v1397_v33, %v1205_v37  ;;  %3016 = vmatmul.msk.f32.gmra.mxu2 %vm249_vm1, %v4041_v32 }
 0x104   : > { %3082 = vmatmul.msk.f32.gmra.mxu3 %vm249_vm1, %v4044_v22 }
 0x105   : > { %4698 = vst [vmem:[#allocation35_spill] sm:$0xff] %v4046_v28  ;;  %3148 = vmatmul.msk.f32.gmra.mxu0 %vm249_vm1, %v3511_v7 }
 0x106   : > { %v843_v0 = vpop.f32.mrf.mxu2 }
 0x107   : > { %v927_v46 = vadd.f32 %v843_v0, %v598_v38  ;;  %v1122_v34 = vpop.f32.mrf.mxu3  ;;  %v600_v33 = vpop.f32.mrf.mxu1  ;;  %v4075_v0 = vld [vmem:[%s3502_s27 + $0x122] sm:$0xff] }
 0x108   : > { %v601_v7 = vadd.f32 %v600_v33, %v3926_v12 }
 0x109   : > { %v1206_v10 = vadd.f32 %v1122_v34, %v927_v46  ;;  %v3050_v34 = vld [vmem:[%s3502_s27 + $0x138] sm:$0xff] }
 0x10a   : > { %v1403_v37 = vpop.f32.mrf.mxu0  ;;  %2983 = vmatmul.msk.f32.gmra.mxu1 %vm249_vm1, %v4027_v18 }
 0x10b   : > { %v4063_v28 = vadd.f32 %v1400_v8, %v1206_v10  ;;  %3017 = vmatmul.msk.f32.gmra.mxu2 %vm249_vm1, %v4058_v45 }
 0x10c   : > { %3083 = vmatmul.msk.f32.gmra.mxu3 %vm249_vm1, %v4061_v29 }
 0x10d   : > { %4699 = vst [vmem:[#allocation36_spill] sm:$0xff] %v4063_v28  ;;  %3149 = vmatmul.msk.f32.gmra.mxu0 %vm249_vm1, %v3528_v11 }
 0x10e   : > { %v846_v26 = vpop.f32.mrf.mxu2 }
 0x10f   : > { %v928_v3 = vadd.f32 %v846_v26, %v601_v7  ;;  %v1125_v38 = vpop.f32.mrf.mxu3  ;;  %v603_v8 = vpop.f32.mrf.mxu1 }
 0x110   : > { %v604_v11 = vadd.f32 %v603_v8, %v3764_v59 }
 0x111   : > { %v1207_v46 = vadd.f32 %v1125_v38, %v928_v3  ;;  %v3051_v38 = vld [vmem:[%s3502_s27 + $0x140] sm:$0xff] }
 0x112   : > { %v1406_v10 = vpop.f32.mrf.mxu0  ;;  %2984 = vmatmul.msk.f32.gmra.mxu1 %vm249_vm1, %v4044_v22 }
 0x113   : > { %v4078_v28 = vadd.f32 %v1403_v37, %v1207_v46  ;;  %3018 = vmatmul.msk.f32.gmra.mxu2 %vm249_vm1, %v4075_v0  ;;  %v4089_v37 = vld [vmem:[%s3502_s27 + $0x12a] sm:$0xff] }
 0x114   : > { %3084 = vmatmul.msk.f32.gmra.mxu3 %vm249_vm1, %v3050_v34 }
 0x115   : > { %4700 = vst [vmem:[#allocation37_spill] sm:$0xff] %v4078_v28  ;;  %3150 = vmatmul.msk.f32.gmra.mxu0 %vm249_vm1, %v3545_v15 }
 0x116   : > { %v849_v12 = vpop.f32.mrf.mxu2 }
 0x117   : > { %v929_v33 = vadd.f32 %v849_v12, %v604_v11  ;;  %v1128_v7 = vpop.f32.mrf.mxu3  ;;  %v606_v26 = vpop.f32.mrf.mxu1 }
 0x118   : > { %v607_v15 = vadd.f32 %v606_v26, %v3786_v1 }
 0x119   : > { %v1208_v3 = vadd.f32 %v1128_v7, %v929_v33  ;;  %v3052_v7 = vld [vmem:[%s3502_s27 + $0x150] sm:$0xff] }
 0x11a   : > { %v1409_v46 = vpop.f32.mrf.mxu0  ;;  %2985 = vmatmul.msk.f32.gmra.mxu1 %vm249_vm1, %v4061_v29 }
 0x11b   : > { %v4092_v28 = vadd.f32 %v1406_v10, %v1208_v3  ;;  %3019 = vmatmul.msk.f32.gmra.mxu2 %vm249_vm1, %v4089_v37  ;;  %v4103_v10 = vld [vmem:[%s3502_s27 + $0x13a] sm:$0xff] }
 0x11c   : > { %3085 = vmatmul.msk.f32.gmra.mxu3 %vm249_vm1, %v3051_v38 }
 0x11d   : > { %4701 = vst [vmem:[#allocation38_spill] sm:$0xff] %v4092_v28  ;;  %3151 = vmatmul.msk.f32.gmra.mxu0 %vm249_vm1, %v3562_v19 }
 0x11e   : > { %v852_v59 = vpop.f32.mrf.mxu2 }
 0x11f   : > { %v930_v8 = vadd.f32 %v852_v59, %v607_v15  ;;  %v1131_v11 = vpop.f32.mrf.mxu3  ;;  %v609_v12 = vpop.f32.mrf.mxu1 }
 0x120   : > { %v610_v19 = vadd.f32 %v609_v12, %v3808_v9 }
 0x121   : > { %v1209_v33 = vadd.f32 %v1131_v11, %v930_v8  ;;  %v702_v8 = vld [vmem:[%s3502_s27 + $0x142] sm:$0xff]  ;;  %v3053_v11 = vld [vmem:[%s3502_s27 + $0x158] sm:$0xff] }
 0x122   : > { %v1412_v3 = vpop.f32.mrf.mxu0  ;;  %2986 = vmatmul.msk.f32.gmra.mxu1 %vm249_vm1, %v3050_v34 }
 0x123   : > { %v4106_v28 = vadd.f32 %v1409_v46, %v1209_v33  ;;  %3020 = vmatmul.msk.f32.gmra.mxu2 %vm249_vm1, %v4103_v10 }
 0x124   : > { %3086 = vmatmul.msk.f32.gmra.mxu3 %vm249_vm1, %v3052_v7 }
 0x125   : > { %3152 = vmatmul.msk.f32.gmra.mxu0 %vm249_vm1, %v3579_v23 }
 0x126   : > { %v855_v1 = vpop.f32.mrf.mxu2 }
 0x127   : > { %v931_v26 = vadd.f32 %v855_v1, %v610_v19  ;;  %v1134_v15 = vpop.f32.mrf.mxu3  ;;  %v612_v59 = vpop.f32.mrf.mxu1 }
 0x128   : > { %v613_v23 = vadd.f32 %v612_v59, %v3830_v25 }
 0x129   : > { %v1210_v46 = vadd.f32 %v1134_v15, %v931_v26  ;;  %v703_v26 = vld [vmem:[%s3502_s27 + $0x152] sm:$0xff]  ;;  %v3054_v15 = vld [vmem:[%s3502_s27 + $0x168] sm:$0xff] }
 0x12a   : > { %v1415_v34 = vpop.f32.mrf.mxu0  ;;  %2987 = vmatmul.msk.f32.gmra.mxu1 %vm249_vm1, %v3051_v38 }
 0x12b   : > { %v4117_v33 = vadd.f32 %v1412_v3, %v1210_v46  ;;  %3021 = vmatmul.msk.f32.gmra.mxu2 %vm249_vm1, %v702_v8 }
 0x12c   : > { %3087 = vmatmul.msk.f32.gmra.mxu3 %vm249_vm1, %v3053_v11 }
 0x12d   : > { %3153 = vmatmul.msk.f32.gmra.mxu0 %vm249_vm1, %v3611_v30 }
 0x12e   : > { %v858_v9 = vpop.f32.mrf.mxu2 }
 0x12f   : > { %v932_v12 = vadd.f32 %v858_v9, %v613_v23  ;;  %v1137_v19 = vpop.f32.mrf.mxu3  ;;  %v615_v1 = vpop.f32.mrf.mxu1  ;;  %v704_v9 = vld [vmem:[%s3502_s27 + $0x15a] sm:$0xff] }
 0x130   : > { %v616_v30 = vadd.f32 %v615_v1, %v3852_v42 }
 0x131   : > { %v1211_v3 = vadd.f32 %v1137_v19, %v932_v12  ;;  %v3055_v12 = vld [vmem:[%s3502_s27 + $0x170] sm:$0xff] }
 0x132   : > { %v1418_v46 = vpop.f32.mrf.mxu0  ;;  %2988 = vmatmul.msk.f32.gmra.mxu1 %vm249_vm1, %v3052_v7 }
 0x133   : > { %v4127_v38 = vadd.f32 %v1415_v34, %v1211_v3  ;;  %3022 = vmatmul.msk.f32.gmra.mxu2 %vm249_vm1, %v703_v26 }
 0x134   : > { %3088 = vmatmul.msk.f32.gmra.mxu3 %vm249_vm1, %v3054_v15 }
 0x135   : > { %3154 = vmatmul.msk.f32.gmra.mxu0 %vm249_vm1, %v3635_v35 }
 0x136   : > { %v861_v25 = vpop.f32.mrf.mxu2 }
 0x137   : > { %v933_v59 = vadd.f32 %v861_v25, %v616_v30  ;;  %v1140_v8 = vpop.f32.mrf.mxu3  ;;  %v618_v23 = vpop.f32.mrf.mxu1  ;;  %v705_v30 = vld [vmem:[%s3502_s27 + $0x16a] sm:$0xff] }
 0x138   : > { %v619_v35 = vadd.f32 %v618_v23, %v3874_v41 }
 0x139   : > { %v1212_v34 = vadd.f32 %v1140_v8, %v933_v59 }
 0x13a   : > { %v1421_v7 = vpop.f32.mrf.mxu0  ;;  %2989 = vmatmul.msk.f32.gmra.mxu1 %vm249_vm1, %v3053_v11  ;;  %v3122_v11 = vld [vmem:[%s3502_s27 + $0x181] sm:$0xff] }
 0x13b   : > { %v4137_v19 = vadd.f32 %v1418_v46, %v1212_v34  ;;  %3023 = vmatmul.msk.f32.gmra.mxu2 %vm249_vm1, %v704_v9  ;;  %v3056_v46 = vld [vmem:[%s3502_s27 + $0x180] sm:$0xff] }
 0x13c   : > { %3089 = vmatmul.msk.f32.gmra.mxu3 %vm249_vm1, %v3055_v12 }
 0x13d   : > { %3155 = vmatmul.msk.f32.gmra.mxu0 %vm249_vm1, %v3655_v39 }
 0x13e   : > { %v864_v42 = vpop.f32.mrf.mxu2 }
 0x13f   : > { %v934_v1 = vadd.f32 %v864_v42, %v619_v35  ;;  %v1143_v26 = vpop.f32.mrf.mxu3  ;;  %v621_v3 = vpop.f32.mrf.mxu1  ;;  %v706_v35 = vld [vmem:[%s3502_s27 + $0x172] sm:$0xff] }
 0x140   : > { %v622_v39 = vadd.f32 %v621_v3, %v3896_v43 }
 0x141   : > { %v1213_v25 = vadd.f32 %v1143_v26, %v934_v1  ;;  %v3057_v1 = vld [vmem:[%s3502_s27 + $0x188] sm:$0xff] }
 0x142   : > { %v1424_v59 = vpop.f32.mrf.mxu0  ;;  %2990 = vmatmul.msk.f32.gmra.mxu1 %vm249_vm1, %v3054_v15 }
 0x143   : > { %v4148_v8 = vadd.f32 %v1421_v7, %v1213_v25  ;;  %3024 = vmatmul.msk.f32.gmra.mxu2 %vm249_vm1, %v705_v30  ;;  %v3123_v7 = vld [vmem:[%s3502_s27 + $0x189] sm:$0xff] }
 0x144   : > { %3090 = vmatmul.msk.f32.gmra.mxu3 %vm249_vm1, %v3056_v46 }
 0x145   : > { %3156 = vmatmul.msk.f32.gmra.mxu0 %vm249_vm1, %v3122_v11 }
 0x146   : > { %v867_v41 = vpop.f32.mrf.mxu2 }
 0x147   : > { %v935_v23 = vadd.f32 %v867_v41, %v622_v39  ;;  %v1146_v9 = vpop.f32.mrf.mxu3  ;;  %v624_v34 = vpop.f32.mrf.mxu1 }
 0x148   : > { %v625_v43 = vadd.f32 %v624_v34, %v3918_v20 }
 0x149   : > { %v1214_v42 = vadd.f32 %v1146_v9, %v935_v23 }
 0x14a   : > { %v1427_v26 = vpop.f32.mrf.mxu0  ;;  %2991 = vmatmul.msk.f32.gmra.mxu1 %vm249_vm1, %v3055_v12 }
 0x14b   : > { %v4158_v25 = vadd.f32 %v1424_v59, %v1214_v42  ;;  %3025 = vmatmul.msk.f32.gmra.mxu2 %vm249_vm1, %v706_v35 }
 0x14c   : > { %3091 = vmatmul.msk.f32.gmra.mxu3 %vm249_vm1, %v3057_v1 }
 0x14d   : > { %3157 = vmatmul.msk.f32.gmra.mxu0 %vm249_vm1, %v3123_v7 }
 0x14e   : > { %v870_v15 = vpop.f32.mrf.mxu2 }
 0x14f   : > { %v936_v3 = vadd.f32 %v870_v15, %v625_v43  ;;  %v1149_v30 = vpop.f32.mrf.mxu3  ;;  %v627_v46 = vpop.f32.mrf.mxu1 }
 0x150   : > { %v628_v20 = vadd.f32 %v627_v46, %v3782_v63 }
 0x151   : > { %v1215_v11 = vadd.f32 %v1149_v30, %v936_v3 }
 0x152   : > { %v1430_v39 = vpop.f32.mrf.mxu0  ;;  %3192 = vmatmul.msk.f32.vlgmr.msra.gmra.mxu1 %vm249_vm1, %v3683_v47 }
 0x153   : > { %v4165_v41 = vadd.f32 %v1427_v26, %v1215_v11  ;;  %3258 = vmatmul.msk.f32.vlgmr.msra.gmra.mxu2 %vm249_vm1, %v3686_v48 }
 0x154   : > { %3324 = vmatmul.msk.f32.vlgmr.msra.gmra.mxu3 %vm249_vm1, %v3582_v24 }
 0x155   : > { %3390 = vmatmul.msk.f32.vlgmr.msra.gmra.mxu0 %vm249_vm1, %v3709_v51 }
 0x156   : > { %v873_v12 = vpop.f32.mrf.mxu2 }
 0x157   : > { %v937_v59 = vadd.f32 %v873_v12, %v628_v20  ;;  %v1152_v23 = vpop.f32.mrf.mxu3  ;;  %v630_v9 = vpop.f32.mrf.mxu1  ;;  %v3294_v20 = vld [vmem:[%s3502_s27 + $0x61] sm:$0xff] }
 0x158   : > { %v631_v24 = vadd.f32 %v630_v9, %v3804_v5 }
 0x159   : > { %v1216_v34 = vadd.f32 %v1152_v23, %v937_v59 }
 0x15a   : > { %v1433_v35 = vpop.f32.mrf.mxu0  ;;  %3193 = vmatmul.msk.f32.gmra.mxu1 %vm249_vm1, %v3696_v49 }
 0x15b   : > { %v4176_v42 = vadd.f32 %v1430_v39, %v1216_v34  ;;  %3259 = vmatmul.msk.f32.gmra.mxu2 %vm249_vm1, %v3699_v50 }
 0x15c   : > { %3325 = vmatmul.msk.f32.gmra.mxu3 %vm249_vm1, %v3614_v31 }
 0x15d   : > { %3391 = vmatmul.msk.f32.gmra.mxu0 %vm249_vm1, %v3723_v53 }
 0x15e   : > { %v876_v47 = vpop.f32.mrf.mxu2 }
 0x15f   : > { %v938_v48 = vadd.f32 %v876_v47, %v631_v24  ;;  %v1155_v63 = vpop.f32.mrf.mxu3  ;;  %v633_v1 = vpop.f32.mrf.mxu1 }
 0x160   : > { %v634_v31 = vadd.f32 %v633_v1, %v3826_v17 }
 0x161   : > { %v1217_v26 = vadd.f32 %v1155_v63, %v938_v48  ;;  %v4705_v48 = vld [vmem:[#allocation20_spill] sm:$0xff] }
 0x162   : > { %v1436_v7 = vpop.f32.mrf.mxu0  ;;  %3194 = vmatmul.msk.f32.gmra.mxu1 %vm249_vm1, %v3709_v51 }
 0x163   : > { %v4187_v43 = vadd.f32 %v1433_v35, %v1217_v26  ;;  %3260 = vmatmul.msk.f32.gmra.mxu2 %vm249_vm1, %v3712_v52  ;;  %v3295_v35 = vld [vmem:[%s3502_s27 + $0x69] sm:$0xff] }
 0x164   : > { %3326 = vmatmul.msk.f32.gmra.mxu3 %vm249_vm1, %v3638_v36 }
 0x165   : > { %3392 = vmatmul.msk.f32.gmra.mxu0 %vm249_vm1, %v3737_v55 }
 0x166   : > { %v879_v49 = vpop.f32.mrf.mxu2 }
 0x167   : > { %v939_v50 = vadd.f32 %v879_v49, %v634_v31  ;;  %v1158_v5 = vpop.f32.mrf.mxu3  ;;  %v636_v15 = vpop.f32.mrf.mxu1 }
 0x168   : > { %v637_v36 = vadd.f32 %v636_v15, %v3848_v21 }
 0x169   : > { %v1218_v3 = vadd.f32 %v1158_v5, %v939_v50  ;;  %v3296_v50 = vld [vmem:[%s3502_s27 + $0x79] sm:$0xff] }
 0x16a   : > { %v1439_v30 = vpop.f32.mrf.mxu0  ;;  %3195 = vmatmul.msk.f32.gmra.mxu1 %vm249_vm1, %v3723_v53 }
 0x16b   : > { %v4198_v46 = vadd.f32 %v1436_v7, %v1218_v3  ;;  %3261 = vmatmul.msk.f32.gmra.mxu2 %vm249_vm1, %v3726_v54  ;;  %v4707_v3 = vld [vmem:[#allocation8_spill] sm:$0xff] }
 0x16c   : > { %3327 = vmatmul.msk.f32.gmra.mxu3 %vm249_vm1, %v3658_v40  ;;  %v4702_v40 = vld [vmem:[#allocation16_spill] sm:$0xff] }
 0x16d   : > { %3393 = vmatmul.msk.f32.gmra.mxu0 %vm249_vm1, %v3751_v57 }
 0x16e   : > { %v882_v51 = vpop.f32.mrf.mxu2 }
 0x16f   : > { %v940_v52 = vadd.f32 %v882_v51, %v637_v36  ;;  %v1161_v17 = vpop.f32.mrf.mxu3  ;;  %v639_v11 = vpop.f32.mrf.mxu1 }
 0x170   : > { %v640_v54 = vadd.f32 %v639_v11, %v4702_v40 }
 0x171   : > { %v1219_v39 = vadd.f32 %v1161_v17, %v940_v52 }
 0x172   : > { %v1442_v12 = vpop.f32.mrf.mxu0  ;;  %3196 = vmatmul.msk.f32.gmra.mxu1 %vm249_vm1, %v3737_v55  ;;  %v4703_v55 = vld [vmem:[#allocation2_spill] sm:$0xff] }
 0x173   : > { %v4210_v53 = vadd.f32 %v1439_v30, %v1219_v39  ;;  %3262 = vmatmul.msk.f32.gmra.mxu2 %vm249_vm1, %v3740_v56  ;;  %v4704_v56 = vld [vmem:[#allocation5_spill] sm:$0xff]  ;;  %v4708_v30 = vld [vmem:[#allocation24_spill] sm:$0xff] }
 0x174   : > { %3328 = vmatmul.msk.f32.gmra.mxu3 %vm249_vm1, %v3294_v20  ;;  %v3297_v20 = vld [vmem:[%s3502_s27 + $0x81] sm:$0xff] }
 0x175   : > { %3394 = vmatmul.msk.f32.gmra.mxu0 %vm249_vm1, %v3767_v60 }
 0x176   : > { %v885_v21 = vpop.f32.mrf.mxu2 }
 0x177   : > { %v941_v59 = vadd.f32 %v885_v21, %v640_v54  ;;  %v1164_v23 = vpop.f32.mrf.mxu3  ;;  %v642_v9 = vpop.f32.mrf.mxu1  ;;  %v4710_v54 = vld [vmem:[#allocation11_spill] sm:$0xff] }
 0x178   : > { %v643_v63 = vadd.f32 %v642_v9, %v4705_v48  ;;  %v4711_v21 = vld [vmem:[#allocation27_spill] sm:$0xff] }
 0x179   : > { %v1220_v34 = vadd.f32 %v1164_v23, %v941_v59 }
 0x17a   : > { %v1445_v24 = vpop.f32.mrf.mxu0  ;;  %3197 = vmatmul.msk.f32.gmra.mxu1 %vm249_vm1, %v3751_v57  ;;  %v4706_v57 = vld [vmem:[#allocation3_spill] sm:$0xff] }
 0x17b   : > { %v4221_v47 = vadd.f32 %v1442_v12, %v1220_v34  ;;  %3263 = vmatmul.msk.f32.gmra.mxu2 %vm249_vm1, %v4703_v55  ;;  %v3298_v55 = vld [vmem:[%s3502_s27 + $0x91] sm:$0xff] }
 0x17c   : > { %3329 = vmatmul.msk.f32.gmra.mxu3 %vm249_vm1, %v3295_v35 }
 0x17d   : > { %3395 = vmatmul.msk.f32.gmra.mxu0 %vm249_vm1, %v4704_v56 }
 0x17e   : > { %v888_v1 = vpop.f32.mrf.mxu2 }
 0x17f   : > { %v942_v26 = vadd.f32 %v888_v1, %v643_v63  ;;  %v1167_v7 = vpop.f32.mrf.mxu3  ;;  %v645_v31 = vpop.f32.mrf.mxu1  ;;  %v4713_v1 = vld [vmem:[#allocation14_spill] sm:$0xff] }
 0x180   : > { %v646_v36 = vadd.f32 %v645_v31, %v4708_v30  ;;  %v3299_v30 = vld [vmem:[%s3502_s27 + $0x99] sm:$0xff] }
 0x181   : > { %v1221_v49 = vadd.f32 %v1167_v7, %v942_v26  ;;  %v4714_v26 = vld [vmem:[#allocation4_spill] sm:$0xff] }
 0x182   : > { %v1448_v5 = vpop.f32.mrf.mxu0  ;;  %3198 = vmatmul.msk.f32.gmra.mxu1 %vm249_vm1, %v3767_v60  ;;  %v4709_v60 = vld [vmem:[#allocation6_spill] sm:$0xff] }
 0x183   : > { %v4232_v15 = vadd.f32 %v1445_v24, %v1221_v49  ;;  %3264 = vmatmul.msk.f32.gmra.mxu2 %vm249_vm1, %v4706_v57 }
 0x184   : > { %3330 = vmatmul.msk.f32.gmra.mxu3 %vm249_vm1, %v3296_v50 }
 0x185   : > { %3396 = vmatmul.msk.f32.gmra.mxu0 %vm249_vm1, %v4707_v3 }
 0x186   : > { %v891_v51 = vpop.f32.mrf.mxu2 }
 0x187   : > { %v943_v52 = vadd.f32 %v891_v51, %v646_v36  ;;  %v1170_v17 = vpop.f32.mrf.mxu3  ;;  %v648_v11 = vpop.f32.mrf.mxu1 }
 0x188   : > { %v649_v59 = vadd.f32 %v648_v11, %v4711_v21 }
 0x189   : > { %v1222_v39 = vadd.f32 %v1170_v17, %v943_v52  ;;  %v4716_v52 = vld [vmem:[#allocation18_spill] sm:$0xff]  ;;  %v4717_v17 = vld [vmem:[#allocation7_spill] sm:$0xff] }
 0x18a   : > { %v1451_v12 = vpop.f32.mrf.mxu0  ;;  %3199 = vmatmul.msk.f32.gmra.mxu1 %vm249_vm1, %v4704_v56  ;;  %v4712_v56 = vld [vmem:[#allocation9_spill] sm:$0xff] }
 0x18b   : > { %v4243_v40 = vadd.f32 %v1448_v5, %v1222_v39  ;;  %3265 = vmatmul.msk.f32.gmra.mxu2 %vm249_vm1, %v4709_v60 }
 0x18c   : > { %3331 = vmatmul.msk.f32.gmra.mxu3 %vm249_vm1, %v3297_v20 }
 0x18d   : > { %3397 = vmatmul.msk.f32.gmra.mxu0 %vm249_vm1, %v4710_v54 }
 0x18e   : > { %v894_v23 = vpop.f32.mrf.mxu2 }
 0x18f   : > { %v944_v9 = vadd.f32 %v894_v23, %v649_v59  ;;  %v1173_v34 = vpop.f32.mrf.mxu3  ;;  %v651_v35 = vpop.f32.mrf.mxu1  ;;  %v3300_v59 = vld [vmem:[%s3502_s27 + $0xa9] sm:$0xff] }
 0x190   : > { %v652_v7 = vadd.f32 %v651_v35, %v4714_v26  ;;  %v4720_v35 = vld [vmem:[#allocation10_spill] sm:$0xff] }
 0x191   : > { %v1223_v24 = vadd.f32 %v1173_v34, %v944_v9  ;;  %v4719_v34 = vld [vmem:[#allocation22_spill] sm:$0xff] }
 0x192   : > { %v1454_v48 = vpop.f32.mrf.mxu0  ;;  %3200 = vmatmul.msk.f32.gmra.mxu1 %vm249_vm1, %v4707_v3  ;;  %v4715_v3 = vld [vmem:[#allocation12_spill] sm:$0xff] }
 0x193   : > { %v4254_v63 = vadd.f32 %v1451_v12, %v1223_v24  ;;  %3266 = vmatmul.msk.f32.gmra.mxu2 %vm249_vm1, %v4712_v56 }
 0x194   : > { %3332 = vmatmul.msk.f32.gmra.mxu3 %vm249_vm1, %v3298_v55 }
 0x195   : > { %3398 = vmatmul.msk.f32.gmra.mxu0 %vm249_vm1, %v4713_v1 }
 0x196   : > { %v897_v31 = vpop.f32.mrf.mxu2 }
 0x197   : > { %v945_v49 = vadd.f32 %v897_v31, %v652_v7  ;;  %v1176_v50 = vpop.f32.mrf.mxu3  ;;  %v654_v5 = vpop.f32.mrf.mxu1  ;;  %v3301_v31 = vld [vmem:[%s3502_s27 + $0xb1] sm:$0xff] }
 0x198   : > { %v655_v11 = vadd.f32 %v654_v5, %v4717_v17  ;;  %v4722_v5 = vld [vmem:[#allocation26_spill] sm:$0xff] }
 0x199   : > { %v1224_v57 = vadd.f32 %v1176_v50, %v945_v49 }
 0x19a   : > { %v1457_v36 = vpop.f32.mrf.mxu0  ;;  %3201 = vmatmul.msk.f32.gmra.mxu1 %vm249_vm1, %v4710_v54  ;;  %v4718_v54 = vld [vmem:[#allocation15_spill] sm:$0xff] }
 0x19b   : > { %v4265_v51 = vadd.f32 %v1454_v48, %v1224_v57  ;;  %3267 = vmatmul.msk.f32.gmra.mxu2 %vm249_vm1, %v4715_v3  ;;  %v4723_v57 = vld [vmem:[#allocation13_spill] sm:$0xff] }
 0x19c   : > { %3333 = vmatmul.msk.f32.gmra.mxu3 %vm249_vm1, %v3299_v30 }
 0x19d   : > { %3399 = vmatmul.msk.f32.gmra.mxu0 %vm249_vm1, %v4716_v52 }
 0x19e   : > { %v900_v39 = vpop.f32.mrf.mxu2 }
 0x19f   : > { %v946_v20 = vadd.f32 %v900_v39, %v655_v11  ;;  %v1179_v12 = vpop.f32.mrf.mxu3  ;;  %v657_v60 = vpop.f32.mrf.mxu1 }
 0x1a0   : > { %v658_v24 = vadd.f32 %v657_v60, %v4720_v35 }
 0x1a1   : > { %v1225_v21 = vadd.f32 %v1179_v12, %v946_v20  ;;  %v3302_v20 = vld [vmem:[%s3502_s27 + $0xc1] sm:$0xff] }
 0x1a2   : > { %v1460_v23 = vpop.f32.mrf.mxu0  ;;  %3202 = vmatmul.msk.f32.gmra.mxu1 %vm249_vm1, %v4713_v1  ;;  %v4721_v1 = vld [vmem:[#allocation19_spill] sm:$0xff] }
 0x1a3   : > { %v4276_v9 = vadd.f32 %v1457_v36, %v1225_v21  ;;  %3268 = vmatmul.msk.f32.gmra.mxu2 %vm249_vm1, %v4718_v54  ;;  %v4725_v21 = vld [vmem:[#allocation29_spill] sm:$0xff] }
 0x1a4   : > { %3334 = vmatmul.msk.f32.gmra.mxu3 %vm249_vm1, %v3300_v59  ;;  %v4726_v59 = vld [vmem:[#allocation17_spill] sm:$0xff] }
 0x1a5   : > { %3400 = vmatmul.msk.f32.gmra.mxu0 %vm249_vm1, %v4719_v34 }
 0x1a6   : > { %v903_v55 = vpop.f32.mrf.mxu2 }
 0x1a7   : > { %v947_v48 = vadd.f32 %v903_v55, %v658_v24  ;;  %v1182_v56 = vpop.f32.mrf.mxu3  ;;  %v660_v26 = vpop.f32.mrf.mxu1 }
 0x1a8   : > { %v661_v30 = vadd.f32 %v660_v26, %v4723_v57 }
 0x1a9   : > { %v1226_v7 = vadd.f32 %v1182_v56, %v947_v48  ;;  %v3303_v56 = vld [vmem:[%s3502_s27 + $0xc9] sm:$0xff] }
 0x1aa   : > { %v1463_v49 = vpop.f32.mrf.mxu0  ;;  %3203 = vmatmul.msk.f32.gmra.mxu1 %vm249_vm1, %v4716_v52  ;;  %v4724_v52 = vld [vmem:[#allocation23_spill] sm:$0xff] }
 0x1ab   : > { %v4287_v50 = vadd.f32 %v1460_v23, %v1226_v7  ;;  %3269 = vmatmul.msk.f32.gmra.mxu2 %vm249_vm1, %v4721_v1 }
 0x1ac   : > { %3335 = vmatmul.msk.f32.gmra.mxu3 %vm249_vm1, %v3301_v31 }
 0x1ad   : > { %3401 = vmatmul.msk.f32.gmra.mxu0 %vm249_vm1, %v4722_v5 }
 0x1ae   : > { %v906_v36 = vpop.f32.mrf.mxu2 }
 0x1af   : > { %v948_v3 = vadd.f32 %v906_v36, %v661_v30  ;;  %v1185_v17 = vpop.f32.mrf.mxu3  ;;  %v663_v11 = vpop.f32.mrf.mxu1 }
 0x1b0   : > { %v664_v23 = vadd.f32 %v663_v11, %v4726_v59 }
 0x1b1   : > { %v1227_v39 = vadd.f32 %v1185_v17, %v948_v3  ;;  %v3304_v3 = vld [vmem:[%s3502_s27 + $0xd9] sm:$0xff] }
 0x1b2   : > { %v1466_v12 = vpop.f32.mrf.mxu0  ;;  %3204 = vmatmul.msk.f32.gmra.mxu1 %vm249_vm1, %v4719_v34  ;;  %v4727_v34 = vld [vmem:[#allocation21_spill] sm:$0xff] }
 0x1b3   : > { %v4298_v60 = vadd.f32 %v1463_v49, %v1227_v39  ;;  %3270 = vmatmul.msk.f32.gmra.mxu2 %vm249_vm1, %v4724_v52 }
 0x1b4   : > { %3336 = vmatmul.msk.f32.gmra.mxu3 %vm249_vm1, %v3302_v20 }
 0x1b5   : > { %3402 = vmatmul.msk.f32.gmra.mxu0 %vm249_vm1, %v4725_v21 }
 0x1b6   : > { %v909_v54 = vpop.f32.mrf.mxu2 }
 0x1b7   : > { %v949_v35 = vadd.f32 %v909_v54, %v664_v23  ;;  %v1188_v24 = vpop.f32.mrf.mxu3  ;;  %v666_v55 = vpop.f32.mrf.mxu1  ;;  %v3305_v23 = vld [vmem:[%s3502_s27 + $0xe1] sm:$0xff] }
 0x1b8   : > { %v667_v31 = vadd.f32 %v666_v55, %v4727_v34  ;;  %v3306_v34 = vld [vmem:[%s3502_s27 + $0xf1] sm:$0xff] }
 0x1b9   : > { %v1228_v48 = vadd.f32 %v1188_v24, %v949_v35 }
 0x1ba   : > { %v1469_v26 = vpop.f32.mrf.mxu0  ;;  %3205 = vmatmul.msk.f32.gmra.mxu1 %vm249_vm1, %v4722_v5 }
 0x1bb   : > { %v4309_v7 = vadd.f32 %v1466_v12, %v1228_v48  ;;  %3271 = vmatmul.msk.f32.gmra.mxu2 %vm249_vm1, %v3924_v44  ;;  %v4728_v44 = vld [vmem:[#allocation25_spill] sm:$0xff] }
 0x1bc   : > { %3337 = vmatmul.msk.f32.gmra.mxu3 %vm249_vm1, %v3303_v56 }
 0x1bd   : > { %3403 = vmatmul.msk.f32.gmra.mxu0 %vm249_vm1, %v3956_v2 }
 0x1be   : > { %v912_v49 = vpop.f32.mrf.mxu2 }
 0x1bf   : > { %v950_v1 = vadd.f32 %v912_v49, %v667_v31  ;;  %v1191_v57 = vpop.f32.mrf.mxu3  ;;  %v669_v30 = vpop.f32.mrf.mxu1 }
 0x1c0   : > { %v670_v5 = vadd.f32 %v669_v30, %v4728_v44 }
 0x1c1   : > { %v1229_v36 = vadd.f32 %v1191_v57, %v950_v1 }
 0x1c2   : > { %v1472_v17 = vpop.f32.mrf.mxu0  ;;  %3206 = vmatmul.msk.f32.gmra.mxu1 %vm249_vm1, %v4725_v21 }
 0x1c3   : > { %v4320_v11 = vadd.f32 %v1469_v26, %v1229_v36  ;;  %3272 = vmatmul.msk.f32.gmra.mxu2 %vm249_vm1, %v3944_v61  ;;  %v4729_v61 = vld [vmem:[#allocation28_spill] sm:$0xff] }
 0x1c4   : > { %3338 = vmatmul.msk.f32.gmra.mxu3 %vm249_vm1, %v3304_v3 }
 0x1c5   : > { %3404 = vmatmul.msk.f32.gmra.mxu0 %vm249_vm1, %v3973_v27 }
 0x1c6   : > { %v915_v39 = vpop.f32.mrf.mxu2 }
 0x1c7   : > { %v951_v20 = vadd.f32 %v915_v39, %v670_v5  ;;  %v1194_v12 = vpop.f32.mrf.mxu3  ;;  %v672_v52 = vpop.f32.mrf.mxu1 }
 0x1c8   : > { %v673_v21 = vadd.f32 %v672_v52, %v4729_v61 }
 0x1c9   : > { %v1230_v59 = vadd.f32 %v1194_v12, %v951_v20 }
 0x1ca   : > { %v1475_v54 = vpop.f32.mrf.mxu0  ;;  %3207 = vmatmul.msk.f32.gmra.mxu1 %vm249_vm1, %v3956_v2 }
 0x1cb   : > { %v4331_v35 = vadd.f32 %v1472_v17, %v1230_v59  ;;  %3273 = vmatmul.msk.f32.gmra.mxu2 %vm249_vm1, %v3959_v58  ;;  %v4730_v58 = vld [vmem:[#allocation30_spill] sm:$0xff] }
 0x1cc   : > { %3339 = vmatmul.msk.f32.gmra.mxu3 %vm249_vm1, %v3305_v23  ;;  %v3307_v17 = vld [vmem:[%s3502_s27 + $0xf9] sm:$0xff]  ;;  %v3308_v23 = vld [vmem:[%s3502_s27 + $0x109] sm:$0xff] }
 0x1cd   : > { %3405 = vmatmul.msk.f32.gmra.mxu0 %vm249_vm1, %v3990_v62 }
 0x1ce   : > { %v918_v24 = vpop.f32.mrf.mxu2 }
 0x1cf   : > { %v952_v55 = vadd.f32 %v918_v24, %v673_v21  ;;  %v1197_v48 = vpop.f32.mrf.mxu3  ;;  %v1660_v56 = vpop.f32.mrf.mxu1  ;;  %v4732_v21 = vld [vmem:[#allocation32_spill] sm:$0xff] }
 0x1d0   : > { %v1756_v49 = vadd.f32 %v1660_v56, %v4730_v58 }
 0x1d1   : > { %v1231_v26 = vadd.f32 %v1197_v48, %v952_v55 }
 0x1d2   : > { %v2495_v31 = vpop.f32.mrf.mxu0  ;;  %3208 = vmatmul.msk.f32.gmra.mxu1 %vm249_vm1, %v3973_v27 }
 0x1d3   : > { %v4342_v2 = vadd.f32 %v1475_v54, %v1231_v26  ;;  %3274 = vmatmul.msk.f32.gmra.mxu2 %vm249_vm1, %v3976_v6  ;;  %v4731_v6 = vld [vmem:[#allocation31_spill] sm:$0xff] }
 0x1d4   : > { %3340 = vmatmul.msk.f32.gmra.mxu3 %vm249_vm1, %v3306_v34 }
 0x1d5   : > { %3406 = vmatmul.msk.f32.gmra.mxu0 %vm249_vm1, %v4007_v4 }
 0x1d6   : > { %v1939_v1 = vpop.f32.mrf.mxu2 }
 0x1d7   : > { %v2035_v57 = vadd.f32 %v1939_v1, %v1756_v49  ;;  %v2217_v30 = vpop.f32.mrf.mxu3  ;;  %v1663_v36 = vpop.f32.mrf.mxu1 }
 0x1d8   : > { %v1757_v5 = vadd.f32 %v1663_v36, %v4731_v6 }
 0x1d9   : > { %v2313_v3 = vadd.f32 %v2217_v30, %v2035_v57  ;;  %v3309_v57 = vld [vmem:[%s3502_s27 + $0x111] sm:$0xff] }
 0x1da   : > { %v2498_v44 = vpop.f32.mrf.mxu0  ;;  %3209 = vmatmul.msk.f32.gmra.mxu1 %vm249_vm1, %v3990_v62 }
 0x1db   : > { %v2591_v27 = vadd.f32 %v2495_v31, %v2313_v3  ;;  %3275 = vmatmul.msk.f32.gmra.mxu2 %vm249_vm1, %v3993_v13  ;;  %v4733_v3 = vld [vmem:[#allocation33_spill] sm:$0xff] }
 0x1dc   : > { %3341 = vmatmul.msk.f32.gmra.mxu3 %vm249_vm1, %v3307_v17 }
 0x1dd   : > { %3407 = vmatmul.msk.f32.gmra.mxu0 %vm249_vm1, %v4024_v16  ;;  %2624 = vst.msk [vmem:[%s4357_s14] sm:$0xff] %vm2623_vm2, %v2591_v27  ;;  %v2725_v54 = vmul.f32 %v2591_v27, %v2591_v27  ;;  %v2656_v13 = vsel %vm2623_vm2, %v2591_v27, 0.0 }
 0x1de   : > { %v1942_v39 = vpop.f32.mrf.mxu2 }
 0x1df   : > { %v2036_v20 = vadd.f32 %v1942_v39, %v1757_v5  ;;  %v2220_v12 = vpop.f32.mrf.mxu3  ;;  %v1666_v52 = vpop.f32.mrf.mxu1 }
 0x1e0   : > { %v1758_v24 = vadd.f32 %v1666_v52, %v4732_v21 }
 0x1e1   : > { %v2314_v59 = vadd.f32 %v2220_v12, %v2036_v20 }
 0x1e2   : > { %v2501_v62 = vpop.f32.mrf.mxu0  ;;  %3210 = vmatmul.msk.f32.gmra.mxu1 %vm249_vm1, %v4007_v4 }
 0x1e3   : > { %v2592_v61 = vadd.f32 %v2498_v44, %v2314_v59  ;;  %3276 = vmatmul.msk.f32.gmra.mxu2 %vm249_vm1, %v4010_v14  ;;  %v2757_v14 = vsel %vm2623_vm2, %v2725_v54, 0.0  ;;  %v3310_v59 = vld [vmem:[%s3502_s27 + $0x121] sm:$0xff] }
 0x1e4   : > { %3342 = vmatmul.msk.f32.gmra.mxu3 %vm249_vm1, %v3308_v23  ;;  %v4734_v54 = vld [vmem:[#allocation34_spill] sm:$0xff] }
 0x1e5   : > { %3408 = vmatmul.msk.f32.gmra.mxu0 %vm249_vm1, %v4041_v32  ;;  %2625 = vst.msk [vmem:[%s4357_s14 + $0x8] sm:$0xff] %vm2623_vm2, %v2592_v61  ;;  %v2657_v55 = vsel %vm2623_vm2, %v2592_v61, 0.0  ;;  %v2726_v48 = vmul.f32 %v2592_v61, %v2592_v61 }
 0x1e6   : > { %v2658_v56 = vadd.f32 %v2657_v55, %v2656_v13  ;;  %v1945_v4 = vpop.f32.mrf.mxu2 }
 0x1e7   : > { %v2758_v26 = vsel %vm2623_vm2, %v2726_v48, 0.0  ;;  %v2037_v34 = vadd.f32 %v1945_v4, %v1758_v24  ;;  %v2223_v31 = vpop.f32.mrf.mxu3  ;;  %v1669_v49 = vpop.f32.mrf.mxu1 }
 0x1e8   : > { %v2759_v58 = vadd.f32 %v2758_v26, %v2757_v14  ;;  %v1759_v17 = vadd.f32 %v1669_v49, %v4733_v3  ;;  %v3311_v26 = vld [vmem:[%s3502_s27 + $0x129] sm:$0xff] }
 0x1e9   : > { %v2315_v1 = vadd.f32 %v2223_v31, %v2037_v34  ;;  %v4735_v31 = vld [vmem:[#allocation35_spill] sm:$0xff] }
 0x1ea   : > { %v2504_v30 = vpop.f32.mrf.mxu0  ;;  %3211 = vmatmul.msk.f32.gmra.mxu1 %vm249_vm1, %v4024_v16 }
 0x1eb   : > { %v2593_v36 = vadd.f32 %v2501_v62, %v2315_v1  ;;  %3277 = vmatmul.msk.f32.gmra.mxu2 %vm249_vm1, %v4027_v18 }
 0x1ec   : > { %3343 = vmatmul.msk.f32.gmra.mxu3 %vm249_vm1, %v3309_v57 }
 0x1ed   : > { %3409 = vmatmul.msk.f32.gmra.mxu0 %vm249_vm1, %v4058_v45  ;;  %2626 = vst.msk [vmem:[%s4357_s14 + $0x10] sm:$0xff] %vm2623_vm2, %v2593_v36  ;;  %v2659_v44 = vsel %vm2623_vm2, %v2593_v36, 0.0  ;;  %v2727_v27 = vmul.f32 %v2593_v36, %v2593_v36 }
 0x1ee   : > { %v2660_v6 = vadd.f32 %v2659_v44, %v2658_v56  ;;  %v1948_v5 = vpop.f32.mrf.mxu2  ;;  %v3180_v44 = vld [vmem:[%s3502_s27 + $0x122] sm:$0xff] }
 0x1ef   : > { %v2760_v16 = vsel %vm2623_vm2, %v2727_v27, 0.0  ;;  %v2038_v39 = vadd.f32 %v1948_v5, %v1759_v17  ;;  %v2226_v20 = vpop.f32.mrf.mxu3  ;;  %v1672_v12 = vpop.f32.mrf.mxu1  ;;  %v3246_v27 = vld [vmem:[%s3502_s27 + $0x138] sm:$0xff] }
 0x1f0   : > { %v2761_v18 = vadd.f32 %v2760_v16, %v2759_v58  ;;  %v1760_v61 = vadd.f32 %v1672_v12, %v4734_v54 }
 0x1f1   : > { %v2316_v52 = vadd.f32 %v2226_v20, %v2038_v39  ;;  %v4736_v39 = vld [vmem:[#allocation36_spill] sm:$0xff] }
 0x1f2   : > { %v2507_v23 = vpop.f32.mrf.mxu0  ;;  %3212 = vmatmul.msk.f32.gmra.mxu1 %vm249_vm1, %v4041_v32 }
 0x1f3   : > { %v2594_v62 = vadd.f32 %v2504_v30, %v2316_v52  ;;  %3278 = vmatmul.msk.f32.gmra.mxu2 %vm249_vm1, %v4044_v22 }
 0x1f4   : > { %3344 = vmatmul.msk.f32.gmra.mxu3 %vm249_vm1, %v3310_v59 }
 0x1f5   : > { %3410 = vmatmul.msk.f32.gmra.mxu0 %vm249_vm1, %v4075_v0  ;;  %2627 = vst.msk [vmem:[%s4357_s14 + $0x18] sm:$0xff] %vm2623_vm2, %v2594_v62  ;;  %v2661_v13 = vsel %vm2623_vm2, %v2594_v62, 0.0  ;;  %v2728_v21 = vmul.f32 %v2594_v62, %v2594_v62 }
 0x1f6   : > { %v2662_v24 = vadd.f32 %v2661_v13, %v2660_v6  ;;  %v1951_v55 = vpop.f32.mrf.mxu2 }
 0x1f7   : > { %v2762_v32 = vsel %vm2623_vm2, %v2728_v21, 0.0  ;;  %v2039_v48 = vadd.f32 %v1951_v55, %v1760_v61  ;;  %v2229_v56 = vpop.f32.mrf.mxu3  ;;  %v1675_v4 = vpop.f32.mrf.mxu1  ;;  %v3181_v21 = vld [vmem:[%s3502_s27 + $0x12a] sm:$0xff]  ;;  %v3313_v55 = vld [vmem:[%s3502_s27 + $0x141] sm:$0xff] }
 0x1f8   : > { %v2763_v22 = vadd.f32 %v2762_v32, %v2761_v18  ;;  %v1761_v58 = vadd.f32 %v1675_v4, %v4735_v31 }
 0x1f9   : > { %v2317_v14 = vadd.f32 %v2229_v56, %v2039_v48  ;;  %v3379_v48 = vld [vmem:[%s3502_s27 + $0x142] sm:$0xff] }
 0x1fa   : > { %v2510_v34 = vpop.f32.mrf.mxu0  ;;  %3213 = vmatmul.msk.f32.gmra.mxu1 %vm249_vm1, %v4058_v45 }
 0x1fb   : > { %v2595_v0 = vadd.f32 %v2507_v23, %v2317_v14  ;;  %3279 = vmatmul.msk.f32.gmra.mxu2 %vm249_vm1, %v4061_v29 }
 0x1fc   : > { %3345 = vmatmul.msk.f32.gmra.mxu3 %vm249_vm1, %v3311_v26 }
 0x1fd   : > { %3411 = vmatmul.msk.f32.gmra.mxu0 %vm249_vm1, %v4089_v37  ;;  %2628 = vst.msk [vmem:[%s4357_s14 + $0x20] sm:$0xff] %vm2623_vm2, %v2595_v0  ;;  %v2663_v49 = vsel %vm2623_vm2, %v2595_v0, 0.0  ;;  %v2729_v1 = vmul.f32 %v2595_v0, %v2595_v0  ;;  %v3312_v37 = vld [vmem:[%s3502_s27 + $0x139] sm:$0xff] }
 0x1fe   : > { %v2664_v57 = vadd.f32 %v2663_v49, %v2662_v24  ;;  %v1954_v30 = vpop.f32.mrf.mxu2  ;;  %v3247_v24 = vld [vmem:[%s3502_s27 + $0x140] sm:$0xff] }
 0x1ff   : > { %v2764_v45 = vsel %vm2623_vm2, %v2729_v1, 0.0  ;;  %v2040_v36 = vadd.f32 %v1954_v30, %v1761_v58  ;;  %v2232_v29 = vpop.f32.mrf.mxu3  ;;  %v1678_v17 = vpop.f32.mrf.mxu1  ;;  %v3182_v30 = vld [vmem:[%s3502_s27 + $0x13a] sm:$0xff] }
 0x200   : > { %v2765_v3 = vadd.f32 %v2764_v45, %v2763_v22  ;;  %v1762_v20 = vadd.f32 %v1678_v17, %v4736_v39  ;;  %v4737_v22 = vld [vmem:[#allocation37_spill] sm:$0xff]  ;;  %v3248_v45 = vld [vmem:[%s3502_s27 + $0x150] sm:$0xff] }
 0x201   : > { %v2318_v6 = vadd.f32 %v2232_v29, %v2040_v36  ;;  %v3314_v29 = vld [vmem:[%s3502_s27 + $0x151] sm:$0xff] }
 0x202   : > { %v2513_v5 = vpop.f32.mrf.mxu0  ;;  %3214 = vmatmul.msk.f32.gmra.mxu1 %vm249_vm1, %v3180_v44  ;;  %v3380_v17 = vld [vmem:[%s3502_s27 + $0x152] sm:$0xff] }
 0x203   : > { %v2596_v16 = vadd.f32 %v2510_v34, %v2318_v6  ;;  %3280 = vmatmul.msk.f32.gmra.mxu2 %vm249_vm1, %v3246_v27  ;;  %v4738_v27 = vld [vmem:[#allocation38_spill] sm:$0xff] }
 0x204   : > { %3346 = vmatmul.msk.f32.gmra.mxu3 %vm249_vm1, %v3312_v37 }
 0x205   : > { %3412 = vmatmul.msk.f32.gmra.mxu0 %vm249_vm1, %v4103_v10  ;;  %2629 = vst.msk [vmem:[%s4357_s14 + $0x28] sm:$0xff] %vm2623_vm2, %v2596_v16  ;;  %v2665_v18 = vsel %vm2623_vm2, %v2596_v16, 0.0  ;;  %v2730_v12 = vmul.f32 %v2596_v16, %v2596_v16 }
 0x206   : > { %v2666_v52 = vadd.f32 %v2665_v18, %v2664_v57  ;;  %v1957_v59 = vpop.f32.mrf.mxu2 }
 0x207   : > { %v2766_v23 = vsel %vm2623_vm2, %v2730_v12, 0.0  ;;  %v2041_v62 = vadd.f32 %v1957_v59, %v1762_v20  ;;  %v2235_v54 = vpop.f32.mrf.mxu3  ;;  %v1681_v13 = vpop.f32.mrf.mxu1 }
 0x208   : > { %v2767_v61 = vadd.f32 %v2766_v23, %v2765_v3  ;;  %v1763_v4 = vadd.f32 %v1681_v13, %v4737_v22  ;;  %v3249_v23 = vld [vmem:[%s3502_s27 + $0x158] sm:$0xff] }
 0x209   : > { %v2319_v10 = vadd.f32 %v2235_v54, %v2041_v62  ;;  %v3315_v54 = vld [vmem:[%s3502_s27 + $0x159] sm:$0xff] }
 0x20a   : > { %v2516_v32 = vpop.f32.mrf.mxu0  ;;  %3215 = vmatmul.msk.f32.gmra.mxu1 %vm249_vm1, %v3181_v21  ;;  %v3381_v13 = vld [vmem:[%s3502_s27 + $0x15a] sm:$0xff] }
 0x20b   : > { %v2597_v56 = vadd.f32 %v2513_v5, %v2319_v10  ;;  %3281 = vmatmul.msk.f32.gmra.mxu2 %vm249_vm1, %v3247_v24 }
 0x20c   : > { %3347 = vmatmul.msk.f32.gmra.mxu3 %vm249_vm1, %v3313_v55 }
 0x20d   : > { %3413 = vmatmul.msk.f32.gmra.mxu0 %vm249_vm1, %v3379_v48  ;;  %2630 = vst.msk [vmem:[%s4357_s14 + $0x30] sm:$0xff] %vm2623_vm2, %v2597_v56  ;;  %v2667_v14 = vsel %vm2623_vm2, %v2597_v56, 0.0  ;;  %v2731_v26 = vmul.f32 %v2597_v56, %v2597_v56 }
 0x20e   : > { %v2668_v34 = vadd.f32 %v2667_v14, %v2666_v52  ;;  %v1960_v0 = vpop.f32.mrf.mxu2 }
 0x20f   : > { %v2768_v31 = vsel %vm2623_vm2, %v2731_v26, 0.0  ;;  %v2042_v58 = vadd.f32 %v1960_v0, %v1763_v4  ;;  %v2238_v49 = vpop.f32.mrf.mxu3  ;;  %v1684_v57 = vpop.f32.mrf.mxu1 }
 0x210   : > { %v2769_v1 = vadd.f32 %v2768_v31, %v2767_v61  ;;  %v1764_v6 = vadd.f32 %v1684_v57, %v4738_v27  ;;  %v3316_v31 = vld [vmem:[%s3502_s27 + $0x169] sm:$0xff] }
 0x211   : > { %v2320_v36 = vadd.f32 %v2238_v49, %v2042_v58  ;;  %v3382_v49 = vld [vmem:[%s3502_s27 + $0x16a] sm:$0xff] }
 0x212   : > { %v2519_v3 = vpop.f32.mrf.mxu0  ;;  %3216 = vmatmul.msk.f32.gmra.mxu1 %vm249_vm1, %v3182_v30 }
 0x213   : > { %v2598_v44 = vadd.f32 %v2516_v32, %v2320_v36  ;;  %3282 = vmatmul.msk.f32.gmra.mxu2 %vm249_vm1, %v3248_v45 }
 0x214   : > { %3348 = vmatmul.msk.f32.gmra.mxu3 %vm249_vm1, %v3314_v29 }
 0x215   : > { %3414 = vmatmul.msk.f32.gmra.mxu0 %vm249_vm1, %v3380_v17  ;;  %2631 = vst.msk [vmem:[%s4357_s14 + $0x38] sm:$0xff] %vm2623_vm2, %v2598_v44  ;;  %v2669_v37 = vsel %vm2623_vm2, %v2598_v44, 0.0  ;;  %v2732_v5 = vmul.f32 %v2598_v44, %v2598_v44 }
 0x216   : > { %v2670_v16 = vadd.f32 %v2669_v37, %v2668_v34  ;;  %v1963_v39 = vpop.f32.mrf.mxu2  ;;  %v3250_v34 = vld [vmem:[%s3502_s27 + $0x168] sm:$0xff] }
 0x217   : > { %v2770_v20 = vsel %vm2623_vm2, %v2732_v5, 0.0  ;;  %v2043_v18 = vadd.f32 %v1963_v39, %v1764_v6  ;;  %v2241_v12 = vpop.f32.mrf.mxu3  ;;  %v1687_v59 = vpop.f32.mrf.mxu1  ;;  %v3251_v6 = vld [vmem:[%s3502_s27 + $0x170] sm:$0xff] }
 0x218   : > { %v2771_v52 = vadd.f32 %v2770_v20, %v2769_v1  ;;  %v1765_v24 = vadd.f32 %v1687_v59, %v4106_v28  ;;  %v3317_v5 = vld [vmem:[%s3502_s27 + $0x171] sm:$0xff] }
 0x219   : > { %v2321_v62 = vadd.f32 %v2241_v12, %v2043_v18  ;;  %v3383_v39 = vld [vmem:[%s3502_s27 + $0x172] sm:$0xff] }
 0x21a   : > { %v2522_v61 = vpop.f32.mrf.mxu0  ;;  %3217 = vmatmul.msk.f32.gmra.mxu1 %vm249_vm1, %v3379_v48 }
 0x21b   : > { %v2599_v21 = vadd.f32 %v2519_v3, %v2321_v62  ;;  %3283 = vmatmul.msk.f32.gmra.mxu2 %vm249_vm1, %v3249_v23 }
 0x21c   : > { %3349 = vmatmul.msk.f32.gmra.mxu3 %vm249_vm1, %v3315_v54 }
 0x21d   : > { %3415 = vmatmul.msk.f32.gmra.mxu0 %vm249_vm1, %v3381_v13  ;;  %2632 = vst.msk [vmem:[%s4357_s14 + $0x40] sm:$0xff] %vm2623_vm2, %v2599_v21  ;;  %v2671_v10 = vsel %vm2623_vm2, %v2599_v21, 0.0  ;;  %v2733_v55 = vmul.f32 %v2599_v21, %v2599_v21  ;;  %v3252_v21 = vld [vmem:[%s3502_s27 + $0x180] sm:$0xff] }
 0x21e   : > { %v2672_v32 = vadd.f32 %v2671_v10, %v2670_v16  ;;  %v1966_v56 = vpop.f32.mrf.mxu2  ;;  %v3318_v10 = vld [vmem:[%s3502_s27 + $0x181] sm:$0xff] }
 0x21f   : > { %v2772_v22 = vsel %vm2623_vm2, %v2733_v55, 0.0  ;;  %v2044_v48 = vadd.f32 %v1966_v56, %v1765_v24  ;;  %v2244_v4 = vpop.f32.mrf.mxu3  ;;  %v1690_v26 = vpop.f32.mrf.mxu1 }
 0x220   : > { %v2773_v14 = vadd.f32 %v2772_v22, %v2771_v52  ;;  %v1766_v1 = vadd.f32 %v1690_v26, %v4117_v33 }
 0x221   : > { %v2322_v0 = vadd.f32 %v2244_v4, %v2044_v48 }
 0x222   : > { %v2525_v58 = vpop.f32.mrf.mxu0  ;;  %3218 = vmatmul.msk.f32.gmra.mxu1 %vm249_vm1, %v3380_v17 }
 0x223   : > { %v2600_v28 = vadd.f32 %v2522_v61, %v2322_v0  ;;  %3284 = vmatmul.msk.f32.gmra.mxu2 %vm249_vm1, %v3250_v34 }
 0x224   : > { %3350 = vmatmul.msk.f32.gmra.mxu3 %vm249_vm1, %v3316_v31 }
 0x225   : > { %3416 = vmatmul.msk.f32.gmra.mxu0 %vm249_vm1, %v3382_v49  ;;  %2633 = vst.msk [vmem:[%s4357_s14 + $0x48] sm:$0xff] %vm2623_vm2, %v2600_v28  ;;  %v2673_v57 = vsel %vm2623_vm2, %v2600_v28, 0.0  ;;  %v2734_v30 = vmul.f32 %v2600_v28, %v2600_v28 }
 0x226   : > { %v2674_v45 = vadd.f32 %v2673_v57, %v2672_v32  ;;  %v1969_v36 = vpop.f32.mrf.mxu2  ;;  %v3384_v32 = vld [vmem:[%s3502_s27 + $0x182] sm:$0xff] }
 0x227   : > { %v2774_v29 = vsel %vm2623_vm2, %v2734_v30, 0.0  ;;  %v2045_v3 = vadd.f32 %v1969_v36, %v1766_v1  ;;  %v2247_v17 = vpop.f32.mrf.mxu3  ;;  %v1693_v27 = vpop.f32.mrf.mxu1  ;;  %v3319_v1 = vld [vmem:[%s3502_s27 + $0x189] sm:$0xff] }
 0x228   : > { %v2775_v44 = vadd.f32 %v2774_v29, %v2773_v14  ;;  %v1767_v20 = vadd.f32 %v1693_v27, %v4127_v38  ;;  %v3385_v30 = vld [vmem:[%s3502_s27 + $0x18a] sm:$0xff] }
 0x229   : > { %v2323_v37 = vadd.f32 %v2247_v17, %v2045_v3 }
 0x22a   : > { %v2528_v16 = vpop.f32.mrf.mxu0  ;;  %3219 = vmatmul.msk.f32.gmra.mxu1 %vm249_vm1, %v3381_v13 }
 0x22b   : > { %v2601_v33 = vadd.f32 %v2525_v58, %v2323_v37  ;;  %3285 = vmatmul.msk.f32.gmra.mxu2 %vm249_vm1, %v3251_v6 }
 0x22c   : > { %3351 = vmatmul.msk.f32.gmra.mxu3 %vm249_vm1, %v3317_v5 }
 0x22d   : > { %3417 = vmatmul.msk.f32.gmra.mxu0 %vm249_vm1, %v3383_v39  ;;  %2634 = vst.msk [vmem:[%s4357_s14 + $0x50] sm:$0xff] %vm2623_vm2, %v2601_v33  ;;  %v2675_v18 = vsel %vm2623_vm2, %v2601_v33, 0.0  ;;  %v2735_v12 = vmul.f32 %v2601_v33, %v2601_v33  ;;  %v3320_v33 = vld [vmem:[%s3502_s27 + $0x199] sm:$0xff] }
 0x22e   : > { %v2676_v52 = vadd.f32 %v2675_v18, %v2674_v45  ;;  %v1972_v59 = vpop.f32.mrf.mxu2  ;;  %v3386_v18 = vld [vmem:[%s3502_s27 + $0x19a] sm:$0xff] }
 0x22f   : > { %v2776_v23 = vsel %vm2623_vm2, %v2735_v12, 0.0  ;;  %v2046_v62 = vadd.f32 %v1972_v59, %v1767_v20  ;;  %v2250_v54 = vpop.f32.mrf.mxu3  ;;  %v1696_v13 = vpop.f32.mrf.mxu1 }
 0x230   : > { %v2777_v61 = vadd.f32 %v2776_v23, %v2775_v44  ;;  %v1768_v56 = vadd.f32 %v1696_v13, %v4137_v19 }
 0x231   : > { %v2324_v24 = vadd.f32 %v2250_v54, %v2046_v62 }
 0x232   : > { %v2531_v55 = vpop.f32.mrf.mxu0  ;;  %3220 = vmatmul.msk.f32.gmra.mxu1 %vm249_vm1, %v3382_v49  ;;  %v3253_v49 = vld [vmem:[%s3502_s27 + $0x188] sm:$0xff] }
 0x233   : > { %v2602_v38 = vadd.f32 %v2528_v16, %v2324_v24  ;;  %3286 = vmatmul.msk.f32.gmra.mxu2 %vm249_vm1, %v3252_v21  ;;  %v3254_v16 = vld [vmem:[%s3502_s27 + $0x198] sm:$0xff] }
 0x234   : > { %3352 = vmatmul.msk.f32.gmra.mxu3 %vm249_vm1, %v3318_v10  ;;  %v3255_v10 = vld [vmem:[%s3502_s27 + $0x1a0] sm:$0xff] }
 0x235   : > { %3418 = vmatmul.msk.f32.gmra.mxu0 %vm249_vm1, %v3384_v32  ;;  %2635 = vst.msk [vmem:[%s4357_s14 + $0x58] sm:$0xff] %vm2623_vm2, %v2602_v38  ;;  %v2677_v22 = vsel %vm2623_vm2, %v2602_v38, 0.0  ;;  %v2736_v48 = vmul.f32 %v2602_v38, %v2602_v38 }
 0x236   : > { %v2678_v4 = vadd.f32 %v2677_v22, %v2676_v52  ;;  %v1975_v14 = vpop.f32.mrf.mxu2 }
 0x237   : > { %v2778_v26 = vsel %vm2623_vm2, %v2736_v48, 0.0  ;;  %v2047_v34 = vadd.f32 %v1975_v14, %v1768_v56  ;;  %v2253_v0 = vpop.f32.mrf.mxu3  ;;  %v1699_v58 = vpop.f32.mrf.mxu1  ;;  %v3387_v56 = vld [vmem:[%s3502_s27 + $0x1a2] sm:$0xff] }
 0x238   : > { %v2779_v31 = vadd.f32 %v2778_v26, %v2777_v61  ;;  %v1769_v45 = vadd.f32 %v1699_v58, %v4148_v8 }
 0x239   : > { %v2325_v28 = vadd.f32 %v2253_v0, %v2047_v34 }
 0x23a   : > { %v2534_v57 = vpop.f32.mrf.mxu0  ;;  %3221 = vmatmul.msk.f32.gmra.mxu1 %vm249_vm1, %v3383_v39 }
 0x23b   : > { %v2603_v19 = vadd.f32 %v2531_v55, %v2325_v28  ;;  %3287 = vmatmul.msk.f32.gmra.mxu2 %vm249_vm1, %v3253_v49 }
 0x23c   : > { %3353 = vmatmul.msk.f32.gmra.mxu3 %vm249_vm1, %v3319_v1 }
 0x23d   : > { %3419 = vmatmul.msk.f32.gmra.mxu0 %vm249_vm1, %v3385_v30  ;;  %2636 = vst.msk [vmem:[%s4357_s14 + $0x60] sm:$0xff] %vm2623_vm2, %v2603_v19  ;;  %v2679_v36 = vsel %vm2623_vm2, %v2603_v19, 0.0  ;;  %v2737_v29 = vmul.f32 %v2603_v19, %v2603_v19 }
 0x23e   : > { %v2680_v3 = vadd.f32 %v2679_v36, %v2678_v4  ;;  %v1978_v17 = vpop.f32.mrf.mxu2 }
 0x23f   : > { %v2780_v44 = vsel %vm2623_vm2, %v2737_v29, 0.0  ;;  %v2048_v27 = vadd.f32 %v1978_v17, %v1769_v45  ;;  %v2256_v6 = vpop.f32.mrf.mxu3  ;;  %v1702_v5 = vpop.f32.mrf.mxu1 }
 0x240   : > { %v2781_v37 = vadd.f32 %v2780_v44, %v2779_v31  ;;  %v1770_v12 = vadd.f32 %v1702_v5, %v4158_v25 }
 0x241   : > { %v2326_v39 = vadd.f32 %v2256_v6, %v2048_v27 }
 0x242   : > { %v2537_v20 = vpop.f32.mrf.mxu0  ;;  %3222 = vmatmul.msk.f32.gmra.mxu1 %vm249_vm1, %v3384_v32  ;;  %v3321_v32 = vld [vmem:[%s3502_s27 + $0x1a1] sm:$0xff] }
 0x243   : > { %v2604_v8 = vadd.f32 %v2534_v57, %v2326_v39  ;;  %3288 = vmatmul.msk.f32.gmra.mxu2 %vm249_vm1, %v3254_v16 }
 0x244   : > { %3354 = vmatmul.msk.f32.gmra.mxu3 %vm249_vm1, %v3320_v33 }
 0x245   : > { %3420 = vmatmul.msk.f32.gmra.mxu0 %vm249_vm1, %v3386_v18  ;;  %2637 = vst.msk [vmem:[%s4357_s14 + $0x68] sm:$0xff] %vm2623_vm2, %v2604_v8  ;;  %v2681_v52 = vsel %vm2623_vm2, %v2604_v8, 0.0  ;;  %v2738_v59 = vmul.f32 %v2604_v8, %v2604_v8 }
 0x246   : > { %v2682_v23 = vadd.f32 %v2681_v52, %v2680_v3  ;;  %v1981_v62 = vpop.f32.mrf.mxu2 }
 0x247   : > { %v2782_v54 = vsel %vm2623_vm2, %v2738_v59, 0.0  ;;  %v2049_v61 = vadd.f32 %v1981_v62, %v1770_v12  ;;  %v2259_v13 = vpop.f32.mrf.mxu3  ;;  %v1705_v24 = vpop.f32.mrf.mxu1 }
 0x248   : > { %v2783_v21 = vadd.f32 %v2782_v54, %v2781_v37  ;;  %v1771_v22 = vadd.f32 %v1705_v24, %v4165_v41 }
 0x249   : > { %v2327_v55 = vadd.f32 %v2259_v13, %v2049_v61 }
 0x24a   : > { %v2540_v38 = vpop.f32.mrf.mxu0  ;;  %3223 = vmatmul.msk.f32.gmra.mxu1 %vm249_vm1, %v3385_v30 }
 0x24b   : > { %v2605_v25 = vadd.f32 %v2537_v20, %v2327_v55  ;;  %3289 = vmatmul.msk.f32.gmra.mxu2 %vm249_vm1, %v3255_v10 }
 0x24c   : > { %3355 = vmatmul.msk.f32.gmra.mxu3 %vm249_vm1, %v3321_v32 }
 0x24d   : > { %3421 = vmatmul.msk.f32.gmra.mxu0 %vm249_vm1, %v3387_v56  ;;  %2638 = vst.msk [vmem:[%s4357_s14 + $0x70] sm:$0xff] %vm2623_vm2, %v2605_v25  ;;  %v2683_v48 = vsel %vm2623_vm2, %v2605_v25, 0.0  ;;  %v2739_v4 = vmul.f32 %v2605_v25, %v2605_v25 }
 0x24e   : > { %v2684_v14 = vadd.f32 %v2683_v48, %v2682_v23  ;;  %v1984_v26 = vpop.f32.mrf.mxu2 }
 0x24f   : > { %v2784_v34 = vsel %vm2623_vm2, %v2739_v4, 0.0  ;;  %v2050_v0 = vadd.f32 %v1984_v26, %v1771_v22  ;;  %v2262_v31 = vpop.f32.mrf.mxu3  ;;  %v1708_v49 = vpop.f32.mrf.mxu1 }
 0x250   : > { %v2785_v58 = vadd.f32 %v2784_v34, %v2783_v21  ;;  %v1772_v30 = vadd.f32 %v1708_v49, %v4176_v42 }
 0x251   : > { %v2328_v28 = vadd.f32 %v2262_v31, %v2050_v0 }
 0x252   : > { %v2543_v1 = vpop.f32.mrf.mxu0 }
 0x253   : > { %v2606_v57 = vadd.f32 %v2540_v38, %v2328_v28 }
 0x255   : > { %2639 = vst.msk [vmem:[%s4357_s14 + $0x78] sm:$0xff] %vm2623_vm2, %v2606_v57  ;;  %v2685_v41 = vsel %vm2623_vm2, %v2606_v57, 0.0  ;;  %v2740_v19 = vmul.f32 %v2606_v57, %v2606_v57 }
 0x256   : > { %v2686_v45 = vadd.f32 %v2685_v41, %v2684_v14  ;;  %v1987_v36 = vpop.f32.mrf.mxu2 }
 0x257   : > { %v2786_v29 = vsel %vm2623_vm2, %v2740_v19, 0.0  ;;  %v2051_v3 = vadd.f32 %v1987_v36, %v1772_v30  ;;  %v2265_v17 = vpop.f32.mrf.mxu3  ;;  %v1711_v27 = vpop.f32.mrf.mxu1 }
 0x258   : > { %v2787_v44 = vadd.f32 %v2786_v29, %v2785_v58  ;;  %v1773_v16 = vadd.f32 %v1711_v27, %v4187_v43 }
 0x259   : > { %v2329_v6 = vadd.f32 %v2265_v17, %v2051_v3 }
 0x25a   : > { %v2546_v37 = vpop.f32.mrf.mxu0 }
 0x25b   : > { %v2607_v5 = vadd.f32 %v2543_v1, %v2329_v6 }
 0x25d   : > { %2640 = vst.msk [vmem:[%s4357_s14 + $0x80] sm:$0xff] %vm2623_vm2, %v2607_v5  ;;  %v2687_v42 = vsel %vm2623_vm2, %v2607_v5, 0.0  ;;  %v2741_v39 = vmul.f32 %v2607_v5, %v2607_v5 }
 0x25e   : > { %v2688_v33 = vadd.f32 %v2687_v42, %v2686_v45  ;;  %v1990_v20 = vpop.f32.mrf.mxu2 }
 0x25f   : > { %v2788_v18 = vsel %vm2623_vm2, %v2741_v39, 0.0  ;;  %v2052_v8 = vadd.f32 %v1990_v20, %v1773_v16  ;;  %v2268_v12 = vpop.f32.mrf.mxu3  ;;  %v1714_v59 = vpop.f32.mrf.mxu1 }
 0x260   : > { %v2789_v52 = vadd.f32 %v2788_v18, %v2787_v44  ;;  %v1774_v61 = vadd.f32 %v1714_v59, %v4198_v46 }
 0x261   : > { %v2330_v23 = vadd.f32 %v2268_v12, %v2052_v8 }
 0x262   : > { %v2549_v62 = vpop.f32.mrf.mxu0 }
 0x263   : > { %v2608_v54 = vadd.f32 %v2546_v37, %v2330_v23 }
 0x265   : > { %2641 = vst.msk [vmem:[%s4357_s14 + $0x88] sm:$0xff] %vm2623_vm2, %v2608_v54  ;;  %v2689_v43 = vsel %vm2623_vm2, %v2608_v54, 0.0  ;;  %v2742_v13 = vmul.f32 %v2608_v54, %v2608_v54 }
 0x266   : > { %v2690_v21 = vadd.f32 %v2689_v43, %v2688_v33  ;;  %v1993_v24 = vpop.f32.mrf.mxu2 }
 0x267   : > { %v2790_v10 = vsel %vm2623_vm2, %v2742_v13, 0.0  ;;  %v2053_v55 = vadd.f32 %v1993_v24, %v1774_v61  ;;  %v2271_v32 = vpop.f32.mrf.mxu3  ;;  %v1717_v56 = vpop.f32.mrf.mxu1 }
 0x268   : > { %v2791_v38 = vadd.f32 %v2790_v10, %v2789_v52  ;;  %v1775_v4 = vadd.f32 %v1717_v56, %v4210_v53 }
 0x269   : > { %v2331_v25 = vadd.f32 %v2271_v32, %v2053_v55 }
 0x26a   : > { %v2552_v22 = vpop.f32.mrf.mxu0 }
 0x26b   : > { %v2609_v48 = vadd.f32 %v2549_v62, %v2331_v25 }
 0x26d   : > { %2642 = vst.msk [vmem:[%s4357_s14 + $0x90] sm:$0xff] %vm2623_vm2, %v2609_v48  ;;  %v2691_v46 = vsel %vm2623_vm2, %v2609_v48, 0.0  ;;  %v2743_v14 = vmul.f32 %v2609_v48, %v2609_v48 }
 0x26e   : > { %v2692_v26 = vadd.f32 %v2691_v46, %v2690_v21  ;;  %v1996_v34 = vpop.f32.mrf.mxu2 }
 0x26f   : > { %v2792_v0 = vsel %vm2623_vm2, %v2743_v14, 0.0  ;;  %v2054_v31 = vadd.f32 %v1996_v34, %v1775_v4  ;;  %v2274_v58 = vpop.f32.mrf.mxu3  ;;  %v1720_v28 = vpop.f32.mrf.mxu1 }
 0x270   : > { %v2793_v49 = vadd.f32 %v2792_v0, %v2791_v38  ;;  %v1776_v41 = vadd.f32 %v1720_v28, %v4221_v47 }
 0x271   : > { %v2332_v1 = vadd.f32 %v2274_v58, %v2054_v31 }
 0x272   : > { %v2555_v57 = vpop.f32.mrf.mxu0 }
 0x273   : > { %v2610_v30 = vadd.f32 %v2552_v22, %v2332_v1 }
 0x275   : > { %2643 = vst.msk [vmem:[%s4357_s14 + $0x98] sm:$0xff] %vm2623_vm2, %v2610_v30  ;;  %v2693_v53 = vsel %vm2623_vm2, %v2610_v30, 0.0  ;;  %v2744_v19 = vmul.f32 %v2610_v30, %v2610_v30 }
 0x276   : > { %v2694_v45 = vadd.f32 %v2693_v53, %v2692_v26  ;;  %v1999_v36 = vpop.f32.mrf.mxu2 }
 0x277   : > { %v2794_v29 = vsel %vm2623_vm2, %v2744_v19, 0.0  ;;  %v2055_v3 = vadd.f32 %v1999_v36, %v1776_v41  ;;  %v2277_v17 = vpop.f32.mrf.mxu3  ;;  %v1723_v27 = vpop.f32.mrf.mxu1 }
 0x278   : > { %v2795_v44 = vadd.f32 %v2794_v29, %v2793_v49  ;;  %v1777_v16 = vadd.f32 %v1723_v27, %v4232_v15 }
 0x279   : > { %v2333_v6 = vadd.f32 %v2277_v17, %v2055_v3 }
 0x27a   : > { %v2558_v37 = vpop.f32.mrf.mxu0 }
 0x27b   : > { %v2611_v5 = vadd.f32 %v2555_v57, %v2333_v6 }
 0x27d   : > { %2644 = vst.msk [vmem:[%s4357_s14 + $0xa0] sm:$0xff] %vm2623_vm2, %v2611_v5  ;;  %v2695_v47 = vsel %vm2623_vm2, %v2611_v5, 0.0  ;;  %v2745_v42 = vmul.f32 %v2611_v5, %v2611_v5 }
 0x27e   : > { %v2696_v39 = vadd.f32 %v2695_v47, %v2694_v45  ;;  %v2002_v33 = vpop.f32.mrf.mxu2 }
 0x27f   : > { %v2796_v20 = vsel %vm2623_vm2, %v2745_v42, 0.0  ;;  %v2056_v18 = vadd.f32 %v2002_v33, %v1777_v16  ;;  %v2280_v8 = vpop.f32.mrf.mxu3  ;;  %v1726_v52 = vpop.f32.mrf.mxu1 }
 0x280   : > { %v2797_v12 = vadd.f32 %v2796_v20, %v2795_v44  ;;  %v1778_v54 = vadd.f32 %v1726_v52, %v4243_v40 }
 0x281   : > { %v2334_v59 = vadd.f32 %v2280_v8, %v2056_v18 }
 0x282   : > { %v2561_v23 = vpop.f32.mrf.mxu0 }
 0x283   : > { %v2612_v62 = vadd.f32 %v2558_v37, %v2334_v59 }
 0x285   : > { %2645 = vst.msk [vmem:[%s4357_s14 + $0xa8] sm:$0xff] %vm2623_vm2, %v2612_v62  ;;  %v2697_v15 = vsel %vm2623_vm2, %v2612_v62, 0.0  ;;  %v2746_v61 = vmul.f32 %v2612_v62, %v2612_v62 }
 0x286   : > { %v2698_v43 = vadd.f32 %v2697_v15, %v2696_v39  ;;  %v2005_v13 = vpop.f32.mrf.mxu2 }
 0x287   : > { %v2798_v21 = vsel %vm2623_vm2, %v2746_v61, 0.0  ;;  %v2057_v24 = vadd.f32 %v2005_v13, %v1778_v54  ;;  %v2283_v10 = vpop.f32.mrf.mxu3  ;;  %v1729_v32 = vpop.f32.mrf.mxu1 }
 0x288   : > { %v2799_v55 = vadd.f32 %v2798_v21, %v2797_v12  ;;  %v1779_v22 = vadd.f32 %v1729_v32, %v4254_v63 }
 0x289   : > { %v2335_v38 = vadd.f32 %v2283_v10, %v2057_v24 }
 0x28a   : > { %v2564_v56 = vpop.f32.mrf.mxu0 }
 0x28b   : > { %v2613_v25 = vadd.f32 %v2561_v23, %v2335_v38 }
 0x28d   : > { %2646 = vst.msk [vmem:[%s4357_s14 + $0xb0] sm:$0xff] %vm2623_vm2, %v2613_v25  ;;  %v2699_v40 = vsel %vm2623_vm2, %v2613_v25, 0.0  ;;  %v2747_v48 = vmul.f32 %v2613_v25, %v2613_v25 }
 0x28e   : > { %v2700_v4 = vadd.f32 %v2699_v40, %v2698_v43  ;;  %v2008_v46 = vpop.f32.mrf.mxu2 }
 0x28f   : > { %v2800_v14 = vsel %vm2623_vm2, %v2747_v48, 0.0  ;;  %v2058_v26 = vadd.f32 %v2008_v46, %v1779_v22  ;;  %v2286_v34 = vpop.f32.mrf.mxu3  ;;  %v1732_v31 = vpop.f32.mrf.mxu1 }
 0x290   : > { %v2801_v0 = vadd.f32 %v2800_v14, %v2799_v55  ;;  %v1780_v1 = vadd.f32 %v1732_v31, %v4265_v51 }
 0x291   : > { %v2336_v58 = vadd.f32 %v2286_v34, %v2058_v26 }
 0x292   : > { %v2567_v49 = vpop.f32.mrf.mxu0 }
 0x293   : > { %v2614_v28 = vadd.f32 %v2564_v56, %v2336_v58 }
 0x295   : > { %2647 = vst.msk [vmem:[%s4357_s14 + $0xb8] sm:$0xff] %vm2623_vm2, %v2614_v28  ;;  %v2701_v63 = vsel %vm2623_vm2, %v2614_v28, 0.0  ;;  %v2748_v57 = vmul.f32 %v2614_v28, %v2614_v28 }
 0x296   : > { %v2702_v30 = vadd.f32 %v2701_v63, %v2700_v4  ;;  %v2011_v41 = vpop.f32.mrf.mxu2 }
 0x297   : > { %v2802_v53 = vsel %vm2623_vm2, %v2748_v57, 0.0  ;;  %v2059_v19 = vadd.f32 %v2011_v41, %v1780_v1  ;;  %v2289_v45 = vpop.f32.mrf.mxu3  ;;  %v1735_v29 = vpop.f32.mrf.mxu1 }
 0x298   : > { %v2803_v36 = vadd.f32 %v2802_v53, %v2801_v0  ;;  %v1781_v27 = vadd.f32 %v1735_v29, %v4276_v9 }
 0x299   : > { %v2337_v3 = vadd.f32 %v2289_v45, %v2059_v19 }
 0x29a   : > { %v2570_v17 = vpop.f32.mrf.mxu0 }
 0x29b   : > { %v2615_v44 = vadd.f32 %v2567_v49, %v2337_v3 }
 0x29d   : > { %2648 = vst.msk [vmem:[%s4357_s14 + $0xc0] sm:$0xff] %vm2623_vm2, %v2615_v44  ;;  %v2703_v51 = vsel %vm2623_vm2, %v2615_v44, 0.0  ;;  %v2749_v6 = vmul.f32 %v2615_v44, %v2615_v44 }
 0x29e   : > { %v2704_v37 = vadd.f32 %v2703_v51, %v2702_v30  ;;  %v2014_v5 = vpop.f32.mrf.mxu2 }
 0x29f   : > { %v2804_v16 = vsel %vm2623_vm2, %v2749_v6, 0.0  ;;  %v2060_v47 = vadd.f32 %v2014_v5, %v1781_v27  ;;  %v2292_v42 = vpop.f32.mrf.mxu3  ;;  %v1738_v33 = vpop.f32.mrf.mxu1 }
 0x2a0   : > { %v2805_v39 = vadd.f32 %v2804_v16, %v2803_v36  ;;  %v1782_v12 = vadd.f32 %v1738_v33, %v4287_v50 }
 0x2a1   : > { %v2338_v20 = vadd.f32 %v2292_v42, %v2060_v47 }
 0x2a2   : > { %v2573_v18 = vpop.f32.mrf.mxu0 }
 0x2a3   : > { %v2616_v8 = vadd.f32 %v2570_v17, %v2338_v20 }
 0x2a5   : > { %2649 = vst.msk [vmem:[%s4357_s14 + $0xc8] sm:$0xff] %vm2623_vm2, %v2616_v8  ;;  %v2705_v9 = vsel %vm2623_vm2, %v2616_v8, 0.0  ;;  %v2750_v52 = vmul.f32 %v2616_v8, %v2616_v8 }
 0x2a6   : > { %v2706_v59 = vadd.f32 %v2705_v9, %v2704_v37  ;;  %v2017_v23 = vpop.f32.mrf.mxu2 }
 0x2a7   : > { %v2806_v62 = vsel %vm2623_vm2, %v2750_v52, 0.0  ;;  %v2061_v54 = vadd.f32 %v2017_v23, %v1782_v12  ;;  %v2295_v15 = vpop.f32.mrf.mxu3  ;;  %v1741_v43 = vpop.f32.mrf.mxu1 }
 0x2a8   : > { %v2807_v61 = vadd.f32 %v2806_v62, %v2805_v39  ;;  %v1783_v10 = vadd.f32 %v1741_v43, %v4298_v60 }
 0x2a9   : > { %v2339_v13 = vadd.f32 %v2295_v15, %v2061_v54 }
 0x2aa   : > { %v2576_v21 = vpop.f32.mrf.mxu0 }
 0x2ab   : > { %v2617_v24 = vadd.f32 %v2573_v18, %v2339_v13 }
 0x2ad   : > { %2650 = vst.msk [vmem:[%s4357_s14 + $0xd0] sm:$0xff] %vm2623_vm2, %v2617_v24  ;;  %v2707_v50 = vsel %vm2623_vm2, %v2617_v24, 0.0  ;;  %v2751_v55 = vmul.f32 %v2617_v24, %v2617_v24 }
 0x2ae   : > { %v2708_v32 = vadd.f32 %v2707_v50, %v2706_v59  ;;  %v2020_v38 = vpop.f32.mrf.mxu2 }
 0x2af   : > { %v2808_v56 = vsel %vm2623_vm2, %v2751_v55, 0.0  ;;  %v2062_v25 = vadd.f32 %v2020_v38, %v1783_v10  ;;  %v2298_v22 = vpop.f32.mrf.mxu3  ;;  %v1744_v48 = vpop.f32.mrf.mxu1 }
 0x2b0   : > { %v2809_v40 = vadd.f32 %v2808_v56, %v2807_v61  ;;  %v1784_v26 = vadd.f32 %v1744_v48, %v4309_v7 }
 0x2b1   : > { %v2340_v4 = vadd.f32 %v2298_v22, %v2062_v25 }
 0x2b2   : > { %v2579_v46 = vpop.f32.mrf.mxu0 }
 0x2b3   : > { %v2618_v14 = vadd.f32 %v2576_v21, %v2340_v4 }
 0x2b5   : > { %2651 = vst.msk [vmem:[%s4357_s14 + $0xd8] sm:$0xff] %vm2623_vm2, %v2618_v14  ;;  %v2709_v60 = vsel %vm2623_vm2, %v2618_v14, 0.0  ;;  %v2752_v34 = vmul.f32 %v2618_v14, %v2618_v14 }
 0x2b6   : > { %v2710_v0 = vadd.f32 %v2709_v60, %v2708_v32  ;;  %v2023_v31 = vpop.f32.mrf.mxu2 }
 0x2b7   : > { %v2810_v58 = vsel %vm2623_vm2, %v2752_v34, 0.0  ;;  %v2063_v49 = vadd.f32 %v2023_v31, %v1784_v26  ;;  %v2301_v28 = vpop.f32.mrf.mxu3  ;;  %v1747_v63 = vpop.f32.mrf.mxu1 }
 0x2b8   : > { %v2811_v1 = vadd.f32 %v2810_v58, %v2809_v40  ;;  %v1785_v53 = vadd.f32 %v1747_v63, %v4320_v11 }
 0x2b9   : > { %v2341_v57 = vadd.f32 %v2301_v28, %v2063_v49 }
 0x2ba   : > { %v2582_v41 = vpop.f32.mrf.mxu0 }
 0x2bb   : > { %v2619_v30 = vadd.f32 %v2579_v46, %v2341_v57 }
 0x2bd   : > { %2652 = vst.msk [vmem:[%s4357_s14 + $0xe0] sm:$0xff] %vm2623_vm2, %v2619_v30  ;;  %v2711_v7 = vsel %vm2623_vm2, %v2619_v30, 0.0  ;;  %v2753_v19 = vmul.f32 %v2619_v30, %v2619_v30 }
 0x2be   : > { %v2712_v45 = vadd.f32 %v2711_v7, %v2710_v0  ;;  %v2026_v36 = vpop.f32.mrf.mxu2 }
 0x2bf   : > { %v2812_v29 = vsel %vm2623_vm2, %v2753_v19, 0.0  ;;  %v2064_v3 = vadd.f32 %v2026_v36, %v1785_v53  ;;  %v2304_v17 = vpop.f32.mrf.mxu3  ;;  %v1750_v27 = vpop.f32.mrf.mxu1 }
 0x2c0   : > { %v2813_v44 = vadd.f32 %v2812_v29, %v2811_v1  ;;  %v1786_v37 = vadd.f32 %v1750_v27, %v4331_v35 }
 0x2c1   : > { %v2342_v51 = vadd.f32 %v2304_v17, %v2064_v3 }
 0x2c2   : > { %v2585_v42 = vpop.f32.mrf.mxu0 }
 0x2c3   : > { %v2620_v6 = vadd.f32 %v2582_v41, %v2342_v51 }
 0x2c5   : > { %2653 = vst.msk [vmem:[%s4357_s14 + $0xe8] sm:$0xff] %vm2623_vm2, %v2620_v6  ;;  %v2713_v11 = vsel %vm2623_vm2, %v2620_v6, 0.0  ;;  %v2754_v5 = vmul.f32 %v2620_v6, %v2620_v6 }
 0x2c6   : > { %v2714_v16 = vadd.f32 %v2713_v11, %v2712_v45  ;;  %v2029_v47 = vpop.f32.mrf.mxu2 }
 0x2c7   : > { %v2814_v39 = vsel %vm2623_vm2, %v2754_v5, 0.0  ;;  %v2065_v33 = vadd.f32 %v2029_v47, %v1786_v37  ;;  %v2307_v20 = vpop.f32.mrf.mxu3  ;;  %v1753_v12 = vpop.f32.mrf.mxu1 }
 0x2c8   : > { %v2815_v18 = vadd.f32 %v2814_v39, %v2813_v44  ;;  %v1787_v52 = vadd.f32 %v1753_v12, %v4342_v2 }
 0x2c9   : > { %v2343_v8 = vadd.f32 %v2307_v20, %v2065_v33 }
 0x2ca   : > { %v2588_v13 = vpop.f32.mrf.mxu0 }
 0x2cb   : > { %v2621_v9 = vadd.f32 %v2585_v42, %v2343_v8 }
 0x2cd   : > { %2654 = vst.msk [vmem:[%s4357_s14 + $0xf0] sm:$0xff] %vm2623_vm2, %v2621_v9  ;;  %v2715_v35 = vsel %vm2623_vm2, %v2621_v9, 0.0  ;;  %v2755_v59 = vmul.f32 %v2621_v9, %v2621_v9 }
 0x2ce   : > { %v2716_v23 = vadd.f32 %v2715_v35, %v2714_v16  ;;  %v2032_v62 = vpop.f32.mrf.mxu2 }
 0x2cf   : > { %v2816_v54 = vsel %vm2623_vm2, %v2755_v59, 0.0  ;;  %v2066_v15 = vadd.f32 %v2032_v62, %v1787_v52  ;;  %v2310_v61 = vpop.f32.mrf.mxu3 }
 0x2d0   : > { %v2817_v43 = vadd.f32 %v2816_v54, %v2815_v18 }
 0x2d1   : > { %v2344_v21 = vadd.f32 %v2310_v61, %v2066_v15 }
 0x2d3   : > { %v2622_v24 = vadd.f32 %v2588_v13, %v2344_v21 }
 0x2d5   : > { %2655 = vst.msk [vmem:[%s4357_s14 + $0xf8] sm:$0xff] %vm2623_vm2, %v2622_v24  ;;  %v2717_v2 = vsel %vm2623_vm2, %v2622_v24, 0.0  ;;  %v2756_v10 = vmul.f32 %v2622_v24, %v2622_v24 }
 0x2d6   : > { %v2718_v50 = vadd.f32 %v2717_v2, %v2716_v23 }
 0x2d7   : > { %v2818_v55 = vsel %vm2623_vm2, %v2756_v10, 0.0 }
 0x2d8   : > { %v2719_v32 = vrot.slane %v2718_v50, 4  ;;  %v2819_v38 = vadd.f32 %v2818_v55, %v2817_v43 }
 0x2da   : > { %v2720_v56 = vadd.f32 %v2719_v32, %v2718_v50  ;;  %v2820_v25 = vrot.slane %v2819_v38, 4 }
 0x2dc   : > { %v2721_v22 = vrot.slane %v2720_v56, 2  ;;  %v2821_v40 = vadd.f32 %v2820_v25, %v2819_v38 }
 0x2de   : > { %v2722_v48 = vadd.f32 %v2721_v22, %v2720_v56  ;;  %v2822_v4 = vrot.slane %v2821_v40, 2 }
 0x2e0   : > { %v2723_v46 = vrot.slane %v2722_v48, 1  ;;  %v2823_v14 = vadd.f32 %v2822_v4, %v2821_v40 }
 0x2e2   : > { %v2824_v26 = vrot.slane %v2823_v14, 1  ;;  %v2724_v60 = vadd.f32 %v2723_v46, %v2722_v48 }
 0x2e4   : > { %v2825_v34 = vadd.f32 %v2824_v26, %v2823_v14 }
 0x2e6   : > { %v2827_v0 = vsel %vm2826_vm3, %v2724_v60, %v2825_v34 }
 0x2e7   : > { %2829 = vst.msk [vmem:[%s181_s18] sm:$0x3] %vm2828_vm4, %v2827_v0 }
 0x2e8 PF: > { %s14_s12 = sadd.s32 1, %s3443_s12  }
 0x2e9   : > { %p11_p4 = scmp.ge.s32.totalorder %s14_s12, 4  }
 0x2eb   :  { %13 = sbr.rel (!%p11_p4) target bundleno = 1 (0x1), region = 80 }

</bundles_post_ra>
